<compile_context>
chip_gen: v7x
topology: tpu7x:2x2x1
jax: 0.10.0
libtpu: 0.0.40
codegen_flags: <defaults>
</compile_context>

<pallas_src>
import functools

import jax
import jax.numpy as jnp
from jax.experimental import pallas as pl
from jax.experimental.pallas import tpu as pltpu


def _round_up(x, m):
    return ((x + m - 1) // m) * m


def _lstm_recurrent_kernel(gx_ref, whh_hbm_ref, h_out_ref,
                           whh_ref, h_ref, c_ref, dma_sem,
                           *, chunk, num_chunks, last_len, hp, unroll,
                           mxu_dtype):
    """One grid step = one (batch block, time chunk).

    gx_ref     : (Tc, Bb, 4*Hp)  precomputed x@W_ih^T + b, time-major (VMEM)
    whh_hbm_ref: (Hp, 4*Hp)      recurrent weights W_hh^T (pl.ANY / HBM)
    h_out_ref  : (Bb, Hp)        last hidden state (resident across chunks)
    whh_ref    : (Hp, 4*Hp)      VMEM scratch, single-buffered weight copy
    h_ref/c_ref: (Bb, Hp)        VMEM-resident recurrent state
    dma_sem    : scalar DMA semaphore
    """
    c_idx = pl.program_id(1)          # time-chunk index (sequential axis)

    # Start of every batch block: zero state (matches init_hidden()) and DMA
    # the recurrent weights into VMEM exactly once (single-buffered).
    @pl.when(c_idx == 0)
    def _init():
        cp = pltpu.make_async_copy(whh_hbm_ref, whh_ref, dma_sem)
        cp.start()
        h_ref[...] = jnp.zeros_like(h_ref)
        c_ref[...] = jnp.zeros_like(c_ref)
        cp.wait()

    def step(s, carry):
        h, c = carry
        # gates = (x_t @ W_ih^T + b)  [precomputed]  +  h @ W_hh^T  [recurrent]
        # RHS streamed from the VMEM ref inside the (unrolled) loop so the
        # whole weight tile is never held live in vregs across the loop.
        gates = gx_ref[s].astype(jnp.float32) + jnp.dot(
            h.astype(mxu_dtype), whh_ref[...],
            preferred_element_type=jnp.float32)

        # PyTorch gate order: input, forget, cell(g), output.
        # Hp is a multiple of 128 -> every slice is lane-aligned.
        i_g = jax.nn.sigmoid(gates[:, 0 * hp:1 * hp])
        f_g = jax.nn.sigmoid(gates[:, 1 * hp:2 * hp])
        g_g = jnp.tanh(gates[:, 2 * hp:3 * hp])
        o_g = jax.nn.sigmoid(gates[:, 3 * hp:4 * hp])

        c_new = f_g * c + i_g * g_g
        h_new = o_g * jnp.tanh(c_new)
        return h_new, c_new

    def run(n_steps):
        h_f, c_f = jax.lax.fori_loop(
            0, n_steps, step, (h_ref[...], c_ref[...]),
            unroll=max(1, min(unroll, n_steps)))
        h_ref[...] = h_f
        c_ref[...] = c_f
        return h_f

    # Non-final chunks: full-length loop, no masking, no output store.
    @pl.when(c_idx < num_chunks - 1)
    def _mid():
        run(chunk)

    # Final chunk: statically shortened loop (skips padded steps entirely)
    # and the only store into the output block for this batch block.
    @pl.when(c_idx == num_chunks - 1)
    def _last():
        h_out_ref[...] = run(last_len)


def lstm_predictor_forward(x, params, *, time_chunk=64, batch_block=256,
                           mxu_dtype=jnp.float32, gx_dtype=None, unroll=8):
    """x: (B, T, I) float32 (batch-first, like the PyTorch module).

    mxu_dtype: dtype of the recurrent-matmul operands (bf16 recommended on
               v6e/v7x; elementwise gate math stays f32 everywhere).
    gx_dtype : storage dtype of the hoisted projection (defaults to mxu_dtype).
    """
    if gx_dtype is None:
        gx_dtype = mxu_dtype
    x = x.astype(jnp.float32)
    B, T, I = x.shape
    H = params["w_hh"].shape[1]

    LANE, SUB = 128, 8
    Hp = _round_up(max(H, LANE), LANE)            # lane-aligned gate width

    # Batch blocking.  A single large block amortizes the serial per-step
    # latency on single-TC chips (v5e/v6e); for B > batch_block we still get
    # >= 2 blocks, which the "parallel" batch axis can shard across v7x's TCs.
    batch_block = max(SUB, _round_up(batch_block, SUB))
    Bb = _round_up(B, SUB) if B <= batch_block else batch_block
    Bp = _round_up(B, Bb)
    nb = Bp // Bb

    w_itemsize = jnp.dtype(mxu_dtype).itemsize
    gx_itemsize = jnp.dtype(gx_dtype).itemsize

    # --- VMEM-budgeted time chunk -------------------------------------------
    # Target ~32 MiB scoped VMEM: safe on every generation (v7x physical is
    # 64 MiB; v5e default scoped is only 16 MiB, so we raise the limit below).
    VMEM_TARGET = 32 * 1024 * 1024
    w_bytes = Hp * 4 * Hp * w_itemsize                       # single-buffered
    fixed_bytes = w_bytes + 4 * Bb * Hp * 4 + (2 << 20)      # state + out + slack
    per_gx_buf = max((VMEM_TARGET - fixed_bytes) // 2, 64 * 1024)
    Tc = int(max(1, min(time_chunk, T,
                        per_gx_buf // max(1, Bb * 4 * Hp * gx_itemsize))))
    nc = -(-T // Tc)                       # ceil-div, python int
    T_pad = nc * Tc
    last_len = T - (nc - 1) * Tc           # valid steps in the final chunk

    gx_bytes = 2 * Tc * Bb * 4 * Hp * gx_itemsize            # double-buffered
    vmem_bytes = gx_bytes + w_bytes + 4 * Bb * Hp * 4
    vmem_limit = int(min(max(vmem_bytes + (8 << 20), 32 << 20), 48 << 20))

    # --- reorganize weights with lane-aligned (zero-padded) gate blocks -----
    # PyTorch stacks gates [i; f; g; o] along rows of W_ih/W_hh (each H rows).
    w_ih = params["w_ih"].reshape(4, H, I)
    w_hh = params["w_hh"].reshape(4, H, H)
    bias = (params["b_ih"] + params["b_hh"]).reshape(4, H)

    w_ih_p = (jnp.zeros((I, 4, Hp), jnp.float32)
              .at[:, :, :H].set(jnp.transpose(w_ih, (2, 0, 1)))
              .reshape(I, 4 * Hp))                              # W_ih^T padded
    w_hh_p = (jnp.zeros((Hp, 4, Hp), jnp.float32)
              .at[:H, :, :H].set(jnp.transpose(w_hh, (2, 0, 1)))
              .reshape(Hp, 4 * Hp))                             # W_hh^T padded
    b_p = (jnp.zeros((4, Hp), jnp.float32).at[:, :H].set(bias)
           .reshape(4 * Hp))

    # --- hoisted input projection: pad x FIRST, one big matmul, no gx pad ---
    # Padded batch rows / time steps carry gx = bias; padded time steps are
    # never executed (static last-chunk loop bound) and padded batch rows are
    # sliced off after the kernel.
    x_p = jnp.pad(x, ((0, Bp - B), (0, T_pad - T), (0, 0)))
    gx = jnp.einsum("bti,ig->tbg", x_p, w_ih_p,
                    preferred_element_type=jnp.float32) + b_p   # (T_pad,Bp,4Hp)
    gx = gx.astype(gx_dtype)
    w_hh_k = w_hh_p.astype(mxu_dtype)

    kernel = functools.partial(
        _lstm_recurrent_kernel, chunk=Tc, num_chunks=nc, last_len=last_len,
        hp=Hp, unroll=unroll, mxu_dtype=mxu_dtype)

    h_last = pl.pallas_call(
        kernel,
        out_shape=jax.ShapeDtypeStruct((Bp, Hp), jnp.float32),
        grid_spec=pltpu.PrefetchScalarGridSpec(
            num_scalar_prefetch=0,
            grid=(nb, nc),                                   # (batch, time-chunks)
            in_specs=[
                pl.BlockSpec((Tc, Bb, 4 * Hp), lambda b, c: (c, b, 0)),  # gates_x
                pl.BlockSpec(memory_space=pl.ANY),           # W_hh^T (manual DMA)
            ],
            out_specs=pl.BlockSpec((Bb, Hp), lambda b, c: (b, 0)),       # h_T
            scratch_shapes=[
                pltpu.VMEM((Hp, 4 * Hp), mxu_dtype),   # single-buffered W_hh^T
                pltpu.VMEM((Bb, Hp), jnp.float32),     # h state
                pltpu.VMEM((Bb, Hp), jnp.float32),     # c state
                pltpu.SemaphoreType.DMA(()),           # weight-copy semaphore
            ],
        ),
        compiler_params=pltpu.CompilerParams(
            dimension_semantics=("parallel", "arbitrary"),
            vmem_limit_bytes=vmem_limit),
    )(gx, w_hh_k)

    # --- tiny fc head (O=1) on the unpadded last hidden state, in XLA -------
    h_T = h_last[:B, :H]
    return h_T @ params["w_fc"].T + params["b_fc"]


def lstm_predictor_reference(x, params):
    """Pure-JAX reference matching PyTorch nn.LSTM + nn.Linear semantics."""
    W_ih, W_hh = params["w_ih"], params["w_hh"]
    b_ih, b_hh = params["b_ih"], params["b_hh"]
    W_fc, b_fc = params["w_fc"], params["b_fc"]
    B = x.shape[0]
    H = W_hh.shape[1]

    def step(carry, x_t):
        h, c = carry
        gates = x_t @ W_ih.T + h @ W_hh.T + b_ih + b_hh
        i, f, g, o = jnp.split(gates, 4, axis=-1)
        i = jax.nn.sigmoid(i)
        f = jax.nn.sigmoid(f)
        g = jnp.tanh(g)
        o = jax.nn.sigmoid(o)
        c = f * c + i * g
        h = o * jnp.tanh(c)
        return (h, c), h

    h0 = jnp.zeros((B, H), jnp.float32)
    c0 = jnp.zeros((B, H), jnp.float32)
    (h_T, _), _ = jax.lax.scan(step, (h0, c0), jnp.transpose(x, (1, 0, 2)))
    return h_T @ W_fc.T + b_fc


def init_params(key, input_size, hidden_size, output_size):
    """Deterministic init matching the PyTorch module's parameter shapes
    (uniform(-1/sqrt(H), 1/sqrt(H)), like nn.LSTM / nn.Linear defaults)."""
    k = 1.0 / jnp.sqrt(jnp.float32(hidden_size))
    keys = jax.random.split(key, 6)
    u = lambda kk, shape: jax.random.uniform(kk, shape, jnp.float32, -k, k)
    return {
        "w_ih": u(keys[0], (4 * hidden_size, input_size)),
        "w_hh": u(keys[1], (4 * hidden_size, hidden_size)),
        "b_ih": u(keys[2], (4 * hidden_size,)),
        "b_hh": u(keys[3], (4 * hidden_size,)),
        "w_fc": u(keys[4], (output_size, hidden_size)),
        "b_fc": u(keys[5], (output_size,)),
    }


if __name__ == "__main__":
    B, T, I, H, O = 2, 8, 16, 32, 1   # batch, seq, input_size, hidden_size, output_size

    key = jax.random.PRNGKey(0)
    kx, kp = jax.random.split(key)
    x = jax.random.normal(kx, (B, T, I), jnp.float32)
    params = init_params(kp, I, H, O)

    ref = jax.block_until_ready(lstm_predictor_reference(x, params))

    # f32 path: exact semantics check against the pure-JAX reference.
    out = jax.block_until_ready(lstm_predictor_forward(x, params))
    assert out.shape == (B, O)
    assert jnp.allclose(out, ref, atol=1e-5, rtol=1e-5), (out, ref)

    # bf16 MXU-operand path (v6e/v7x recommendation): looser tolerance.
    out_bf16 = jax.block_until_ready(
        lstm_predictor_forward(x, params, mxu_dtype=jnp.bfloat16))
    assert out_bf16.shape == (B, O)
    assert jnp.allclose(out_bf16, ref, atol=5e-2, rtol=5e-2), (out_bf16, ref)

    print("KERNEL_OK")
</pallas_src>

<mosaic_0001>
module attributes {stable_mosaic.version = 11 : i64} {
  func.func @_lstm_recurrent_kernel(%arg0: i32, %arg1: i32, %arg2: memref<8x8x512xf32, #tpu.memory_space<vmem>>, %arg3: memref<128x512xf32, #tpu.memory_space<any>>, %arg4: memref<8x128xf32, #tpu.memory_space<vmem>>, %arg5: memref<128x512xf32, #tpu.memory_space<vmem>>, %arg6: memref<8x128xf32, #tpu.memory_space<vmem>>, %arg7: memref<8x128xf32, #tpu.memory_space<vmem>>, %arg8: memref<!tpu.dma_semaphore, #tpu.memory_space<semaphore_mem>>) attributes {dimension_semantics = [#tpu.dimension_semantics<parallel>, #tpu.dimension_semantics<arbitrary>], iteration_bounds = array<i64: 1, 1>, scalar_prefetch = 0 : i64, scratch_operands = 4 : i64, tpu.core_type = #tpu.core_type<tc>, window_params = [{transform_indices = @transform_0, window_bounds = array<i64: 8, 8, 512>}, {}, {transform_indices = @transform_2, window_bounds = array<i64: 8, 128>}]} {
    %c0_i32 = arith.constant 0 : i32
    %0 = arith.cmpi eq, %arg1, %c0_i32 : i32
    %1 = arith.extui %0 : i1 to i32
    %c0_i32_0 = arith.constant 0 : i32
    %2 = arith.cmpi ne, %1, %c0_i32_0 : i32
    scf.if %2 {
      tpu.enqueue_dma source(%arg3 : memref<128x512xf32, #tpu.memory_space<any>>) target(%arg5 : memref<128x512xf32, #tpu.memory_space<vmem>>) target_semaphore(%arg8 : memref<!tpu.dma_semaphore, #tpu.memory_space<semaphore_mem>>)
      %cst = arith.constant 0.000000e+00 : f32
      %9 = vector.broadcast %cst : f32 to vector<8x128xf32>
      %c0 = arith.constant 0 : index
      %c0_5 = arith.constant 0 : index
      %10 = vector.load %arg6[%c0, %c0_5] : memref<8x128xf32, #tpu.memory_space<vmem>>, vector<8x128xf32>
      tpu.vector_store %arg6[%c0, %c0_5], %9 {strides = array<i32>} : memref<8x128xf32, #tpu.memory_space<vmem>>, vector<8x128xf32>,
      %cst_6 = arith.constant 0.000000e+00 : f32
      %11 = vector.broadcast %cst_6 : f32 to vector<8x128xf32>
      %c0_7 = arith.constant 0 : index
      %c0_8 = arith.constant 0 : index
      %12 = vector.load %arg7[%c0_7, %c0_8] : memref<8x128xf32, #tpu.memory_space<vmem>>, vector<8x128xf32>
      tpu.vector_store %arg7[%c0_7, %c0_8], %11 {strides = array<i32>} : memref<8x128xf32, #tpu.memory_space<vmem>>, vector<8x128xf32>,
      tpu.wait_dma2 semaphore(%arg8 : memref<!tpu.dma_semaphore, #tpu.memory_space<semaphore_mem>>) src(%arg3 : memref<128x512xf32, #tpu.memory_space<any>>) dst(%arg5 : memref<128x512xf32, #tpu.memory_space<vmem>>)
    } else {
    }
    %c0_i32_1 = arith.constant 0 : i32
    %3 = arith.cmpi slt, %arg1, %c0_i32_1 : i32
    %4 = arith.extui %3 : i1 to i32
    %c0_i32_2 = arith.constant 0 : i32
    %5 = arith.cmpi ne, %4, %c0_i32_2 : i32
    scf.if %5 {
      %c0 = arith.constant 0 : index
      %c0_5 = arith.constant 0 : index
      %9 = vector.load %arg6[%c0, %c0_5] : memref<8x128xf32, #tpu.memory_space<vmem>>, vector<8x128xf32>
      %c0_6 = arith.constant 0 : index
      %c0_7 = arith.constant 0 : index
      %10 = vector.load %arg7[%c0_6, %c0_7] : memref<8x128xf32, #tpu.memory_space<vmem>>, vector<8x128xf32>
      %c0_i32_8 = arith.constant 0 : i32
      %11 = arith.index_cast %c0_i32_8 : i32 to index
      %c0_9 = arith.constant 0 : index
      %c0_10 = arith.constant 0 : index
      %12 = vector.load %arg2[%11, %c0_9, %c0_10] : memref<8x8x512xf32, #tpu.memory_space<vmem>>, vector<1x8x512xf32>
      %13 = vector.shape_cast %12 : vector<1x8x512xf32> to vector<8x512xf32>
      %c0_11 = arith.constant 0 : index
      %c0_12 = arith.constant 0 : index
      %14 = vector.load %arg5[%c0_11, %c0_12] : memref<128x512xf32, #tpu.memory_space<vmem>>, vector<128x512xf32>
      %cst = arith.constant dense<0.000000e+00> : vector<8x512xf32>
      %15 = tpu.matmul %9, %14, %cst {dimension_numbers = #tpu.dot_dimension_numbers<[1], [0], [0], [1], [0, 0, 1, 1], [], []>} : vector<8x128xf32>, vector<128x512xf32>, vector<8x512xf32> -> vector<8x512xf32>
      %16 = arith.addf %13, %15 : vector<8x512xf32>
      %17 = vector.extract_strided_slice %16 {offsets = [0, 0], sizes = [8, 128], strides = [1, 1]} : vector<8x512xf32> to vector<8x128xf32>
      %18 = arith.negf %17 : vector<8x128xf32>
      %19 = math.exp %18 : vector<8x128xf32>
      %cst_13 = arith.constant 1.000000e+00 : f32
      %20 = vector.broadcast %cst_13 : f32 to vector<8x128xf32>
      %21 = arith.addf %20, %19 : vector<8x128xf32>
      %22 = arith.divf %20, %21 : vector<8x128xf32>
      %23 = vector.extract_strided_slice %16 {offsets = [0, 128], sizes = [8, 128], strides = [1, 1]} : vector<8x512xf32> to vector<8x128xf32>
      %24 = arith.negf %23 : vector<8x128xf32>
      %25 = math.exp %24 : vector<8x128xf32>
      %cst_14 = arith.constant 1.000000e+00 : f32
      %26 = vector.broadcast %cst_14 : f32 to vector<8x128xf32>
      %27 = arith.addf %26, %25 : vector<8x128xf32>
      %28 = arith.divf %26, %27 : vector<8x128xf32>
      %29 = vector.extract_strided_slice %16 {offsets = [0, 256], sizes = [8, 128], strides = [1, 1]} : vector<8x512xf32> to vector<8x128xf32>
      %30 = math.tanh %29 : vector<8x128xf32>
      %31 = vector.extract_strided_slice %16 {offsets = [0, 384], sizes = [8, 128], strides = [1, 1]} : vector<8x512xf32> to vector<8x128xf32>
      %32 = arith.negf %31 : vector<8x128xf32>
      %33 = math.exp %32 : vector<8x128xf32>
      %cst_15 = arith.constant 1.000000e+00 : f32
      %34 = vector.broadcast %cst_15 : f32 to vector<8x128xf32>
      %35 = arith.addf %34, %33 : vector<8x128xf32>
      %36 = arith.divf %34, %35 : vector<8x128xf32>
      %37 = arith.mulf %28, %10 : vector<8x128xf32>
      %38 = arith.mulf %22, %30 : vector<8x128xf32>
      %39 = arith.addf %37, %38 : vector<8x128xf32>
      %40 = math.tanh %39 : vector<8x128xf32>
      %41 = arith.mulf %36, %40 : vector<8x128xf32>
      %c1_i32 = arith.constant 1 : i32
      %42 = arith.index_cast %c1_i32 : i32 to index
      %c0_16 = arith.constant 0 : index
      %c0_17 = arith.constant 0 : index
      %43 = vector.load %arg2[%42, %c0_16, %c0_17] : memref<8x8x512xf32, #tpu.memory_space<vmem>>, vector<1x8x512xf32>
      %44 = vector.shape_cast %43 : vector<1x8x512xf32> to vector<8x512xf32>
      %c0_18 = arith.constant 0 : index
      %c0_19 = arith.constant 0 : index
      %45 = vector.load %arg5[%c0_18, %c0_19] : memref<128x512xf32, #tpu.memory_space<vmem>>, vector<128x512xf32>
      %cst_20 = arith.constant dense<0.000000e+00> : vector<8x512xf32>
      %46 = tpu.matmul %41, %45, %cst_20 {dimension_numbers = #tpu.dot_dimension_numbers<[1], [0], [0], [1], [0, 0, 1, 1], [], []>} : vector<8x128xf32>, vector<128x512xf32>, vector<8x512xf32> -> vector<8x512xf32>
      %47 = arith.addf %44, %46 : vector<8x512xf32>
      %48 = vector.extract_strided_slice %47 {offsets = [0, 0], sizes = [8, 128], strides = [1, 1]} : vector<8x512xf32> to vector<8x128xf32>
      %49 = arith.negf %48 : vector<8x128xf32>
      %50 = math.exp %49 : vector<8x128xf32>
      %cst_21 = arith.constant 1.000000e+00 : f32
      %51 = vector.broadcast %cst_21 : f32 to vector<8x128xf32>
      %52 = arith.addf %51, %50 : vector<8x128xf32>
      %53 = arith.divf %51, %52 : vector<8x128xf32>
      %54 = vector.extract_strided_slice %47 {offsets = [0, 128], sizes = [8, 128], strides = [1, 1]} : vector<8x512xf32> to vector<8x128xf32>
      %55 = arith.negf %54 : vector<8x128xf32>
      %56 = math.exp %55 : vector<8x128xf32>
      %cst_22 = arith.constant 1.000000e+00 : f32
      %57 = vector.broadcast %cst_22 : f32 to vector<8x128xf32>
      %58 = arith.addf %57, %56 : vector<8x128xf32>
      %59 = arith.divf %57, %58 : vector<8x128xf32>
      %60 = vector.extract_strided_slice %47 {offsets = [0, 256], sizes = [8, 128], strides = [1, 1]} : vector<8x512xf32> to vector<8x128xf32>
      %61 = math.tanh %60 : vector<8x128xf32>
      %62 = vector.extract_strided_slice %47 {offsets = [0, 384], sizes = [8, 128], strides = [1, 1]} : vector<8x512xf32> to vector<8x128xf32>
      %63 = arith.negf %62 : vector<8x128xf32>
      %64 = math.exp %63 : vector<8x128xf32>
      %cst_23 = arith.constant 1.000000e+00 : f32
      %65 = vector.broadcast %cst_23 : f32 to vector<8x128xf32>
      %66 = arith.addf %65, %64 : vector<8x128xf32>
      %67 = arith.divf %65, %66 : vector<8x128xf32>
      %68 = arith.mulf %59, %39 : vector<8x128xf32>
      %69 = arith.mulf %53, %61 : vector<8x128xf32>
      %70 = arith.addf %68, %69 : vector<8x128xf32>
      %71 = math.tanh %70 : vector<8x128xf32>
      %72 = arith.mulf %67, %71 : vector<8x128xf32>
      %c2_i32 = arith.constant 2 : i32
      %73 = arith.index_cast %c2_i32 : i32 to index
      %c0_24 = arith.constant 0 : index
      %c0_25 = arith.constant 0 : index
      %74 = vector.load %arg2[%73, %c0_24, %c0_25] : memref<8x8x512xf32, #tpu.memory_space<vmem>>, vector<1x8x512xf32>
      %75 = vector.shape_cast %74 : vector<1x8x512xf32> to vector<8x512xf32>
      %c0_26 = arith.constant 0 : index
      %c0_27 = arith.constant 0 : index
      %76 = vector.load %arg5[%c0_26, %c0_27] : memref<128x512xf32, #tpu.memory_space<vmem>>, vector<128x512xf32>
      %cst_28 = arith.constant dense<0.000000e+00> : vector<8x512xf32>
      %77 = tpu.matmul %72, %76, %cst_28 {dimension_numbers = #tpu.dot_dimension_numbers<[1], [0], [0], [1], [0, 0, 1, 1], [], []>} : vector<8x128xf32>, vector<128x512xf32>, vector<8x512xf32> -> vector<8x512xf32>
      %78 = arith.addf %75, %77 : vector<8x512xf32>
      %79 = vector.extract_strided_slice %78 {offsets = [0, 0], sizes = [8, 128], strides = [1, 1]} : vector<8x512xf32> to vector<8x128xf32>
      %80 = arith.negf %79 : vector<8x128xf32>
      %81 = math.exp %80 : vector<8x128xf32>
      %cst_29 = arith.constant 1.000000e+00 : f32
      %82 = vector.broadcast %cst_29 : f32 to vector<8x128xf32>
      %83 = arith.addf %82, %81 : vector<8x128xf32>
      %84 = arith.divf %82, %83 : vector<8x128xf32>
      %85 = vector.extract_strided_slice %78 {offsets = [0, 128], sizes = [8, 128], strides = [1, 1]} : vector<8x512xf32> to vector<8x128xf32>
      %86 = arith.negf %85 : vector<8x128xf32>
      %87 = math.exp %86 : vector<8x128xf32>
      %cst_30 = arith.constant 1.000000e+00 : f32
      %88 = vector.broadcast %cst_30 : f32 to vector<8x128xf32>
      %89 = arith.addf %88, %87 : vector<8x128xf32>
      %90 = arith.divf %88, %89 : vector<8x128xf32>
      %91 = vector.extract_strided_slice %78 {offsets = [0, 256], sizes = [8, 128], strides = [1, 1]} : vector<8x512xf32> to vector<8x128xf32>
      %92 = math.tanh %91 : vector<8x128xf32>
      %93 = vector.extract_strided_slice %78 {offsets = [0, 384], sizes = [8, 128], strides = [1, 1]} : vector<8x512xf32> to vector<8x128xf32>
      %94 = arith.negf %93 : vector<8x128xf32>
      %95 = math.exp %94 : vector<8x128xf32>
      %cst_31 = arith.constant 1.000000e+00 : f32
      %96 = vector.broadcast %cst_31 : f32 to vector<8x128xf32>
      %97 = arith.addf %96, %95 : vector<8x128xf32>
      %98 = arith.divf %96, %97 : vector<8x128xf32>
      %99 = arith.mulf %90, %70 : vector<8x128xf32>
      %100 = arith.mulf %84, %92 : vector<8x128xf32>
      %101 = arith.addf %99, %100 : vector<8x128xf32>
      %102 = math.tanh %101 : vector<8x128xf32>
      %103 = arith.mulf %98, %102 : vector<8x128xf32>
      %c3_i32 = arith.constant 3 : i32
      %104 = arith.index_cast %c3_i32 : i32 to index
      %c0_32 = arith.constant 0 : index
      %c0_33 = arith.constant 0 : index
      %105 = vector.load %arg2[%104, %c0_32, %c0_33] : memref<8x8x512xf32, #tpu.memory_space<vmem>>, vector<1x8x512xf32>
      %106 = vector.shape_cast %105 : vector<1x8x512xf32> to vector<8x512xf32>
      %c0_34 = arith.constant 0 : index
      %c0_35 = arith.constant 0 : index
      %107 = vector.load %arg5[%c0_34, %c0_35] : memref<128x512xf32, #tpu.memory_space<vmem>>, vector<128x512xf32>
      %cst_36 = arith.constant dense<0.000000e+00> : vector<8x512xf32>
      %108 = tpu.matmul %103, %107, %cst_36 {dimension_numbers = #tpu.dot_dimension_numbers<[1], [0], [0], [1], [0, 0, 1, 1], [], []>} : vector<8x128xf32>, vector<128x512xf32>, vector<8x512xf32> -> vector<8x512xf32>
      %109 = arith.addf %106, %108 : vector<8x512xf32>
      %110 = vector.extract_strided_slice %109 {offsets = [0, 0], sizes = [8, 128], strides = [1, 1]} : vector<8x512xf32> to vector<8x128xf32>
      %111 = arith.negf %110 : vector<8x128xf32>
      %112 = math.exp %111 : vector<8x128xf32>
      %cst_37 = arith.constant 1.000000e+00 : f32
      %113 = vector.broadcast %cst_37 : f32 to vector<8x128xf32>
      %114 = arith.addf %113, %112 : vector<8x128xf32>
      %115 = arith.divf %113, %114 : vector<8x128xf32>
      %116 = vector.extract_strided_slice %109 {offsets = [0, 128], sizes = [8, 128], strides = [1, 1]} : vector<8x512xf32> to vector<8x128xf32>
      %117 = arith.negf %116 : vector<8x128xf32>
      %118 = math.exp %117 : vector<8x128xf32>
      %cst_38 = arith.constant 1.000000e+00 : f32
      %119 = vector.broadcast %cst_38 : f32 to vector<8x128xf32>
      %120 = arith.addf %119, %118 : vector<8x128xf32>
      %121 = arith.divf %119, %120 : vector<8x128xf32>
      %122 = vector.extract_strided_slice %109 {offsets = [0, 256], sizes = [8, 128], strides = [1, 1]} : vector<8x512xf32> to vector<8x128xf32>
      %123 = math.tanh %122 : vector<8x128xf32>
      %124 = vector.extract_strided_slice %109 {offsets = [0, 384], sizes = [8, 128], strides = [1, 1]} : vector<8x512xf32> to vector<8x128xf32>
      %125 = arith.negf %124 : vector<8x128xf32>
      %126 = math.exp %125 : vector<8x128xf32>
      %cst_39 = arith.constant 1.000000e+00 : f32
      %127 = vector.broadcast %cst_39 : f32 to vector<8x128xf32>
      %128 = arith.addf %127, %126 : vector<8x128xf32>
      %129 = arith.divf %127, %128 : vector<8x128xf32>
      %130 = arith.mulf %121, %101 : vector<8x128xf32>
      %131 = arith.mulf %115, %123 : vector<8x128xf32>
      %132 = arith.addf %130, %131 : vector<8x128xf32>
      %133 = math.tanh %132 : vector<8x128xf32>
      %134 = arith.mulf %129, %133 : vector<8x128xf32>
      %c4_i32 = arith.constant 4 : i32
      %135 = arith.index_cast %c4_i32 : i32 to index
      %c0_40 = arith.constant 0 : index
      %c0_41 = arith.constant 0 : index
      %136 = vector.load %arg2[%135, %c0_40, %c0_41] : memref<8x8x512xf32, #tpu.memory_space<vmem>>, vector<1x8x512xf32>
      %137 = vector.shape_cast %136 : vector<1x8x512xf32> to vector<8x512xf32>
      %c0_42 = arith.constant 0 : index
      %c0_43 = arith.constant 0 : index
      %138 = vector.load %arg5[%c0_42, %c0_43] : memref<128x512xf32, #tpu.memory_space<vmem>>, vector<128x512xf32>
      %cst_44 = arith.constant dense<0.000000e+00> : vector<8x512xf32>
      %139 = tpu.matmul %134, %138, %cst_44 {dimension_numbers = #tpu.dot_dimension_numbers<[1], [0], [0], [1], [0, 0, 1, 1], [], []>} : vector<8x128xf32>, vector<128x512xf32>, vector<8x512xf32> -> vector<8x512xf32>
      %140 = arith.addf %137, %139 : vector<8x512xf32>
      %141 = vector.extract_strided_slice %140 {offsets = [0, 0], sizes = [8, 128], strides = [1, 1]} : vector<8x512xf32> to vector<8x128xf32>
      %142 = arith.negf %141 : vector<8x128xf32>
      %143 = math.exp %142 : vector<8x128xf32>
      %cst_45 = arith.constant 1.000000e+00 : f32
      %144 = vector.broadcast %cst_45 : f32 to vector<8x128xf32>
      %145 = arith.addf %144, %143 : vector<8x128xf32>
      %146 = arith.divf %144, %145 : vector<8x128xf32>
      %147 = vector.extract_strided_slice %140 {offsets = [0, 128], sizes = [8, 128], strides = [1, 1]} : vector<8x512xf32> to vector<8x128xf32>
      %148 = arith.negf %147 : vector<8x128xf32>
      %149 = math.exp %148 : vector<8x128xf32>
      %cst_46 = arith.constant 1.000000e+00 : f32
      %150 = vector.broadcast %cst_46 : f32 to vector<8x128xf32>
      %151 = arith.addf %150, %149 : vector<8x128xf32>
      %152 = arith.divf %150, %151 : vector<8x128xf32>
      %153 = vector.extract_strided_slice %140 {offsets = [0, 256], sizes = [8, 128], strides = [1, 1]} : vector<8x512xf32> to vector<8x128xf32>
      %154 = math.tanh %153 : vector<8x128xf32>
      %155 = vector.extract_strided_slice %140 {offsets = [0, 384], sizes = [8, 128], strides = [1, 1]} : vector<8x512xf32> to vector<8x128xf32>
      %156 = arith.negf %155 : vector<8x128xf32>
      %157 = math.exp %156 : vector<8x128xf32>
      %cst_47 = arith.constant 1.000000e+00 : f32
      %158 = vector.broadcast %cst_47 : f32 to vector<8x128xf32>
      %159 = arith.addf %158, %157 : vector<8x128xf32>
      %160 = arith.divf %158, %159 : vector<8x128xf32>
      %161 = arith.mulf %152, %132 : vector<8x128xf32>
      %162 = arith.mulf %146, %154 : vector<8x128xf32>
      %163 = arith.addf %161, %162 : vector<8x128xf32>
      %164 = math.tanh %163 : vector<8x128xf32>
      %165 = arith.mulf %160, %164 : vector<8x128xf32>
      %c5_i32 = arith.constant 5 : i32
      %166 = arith.index_cast %c5_i32 : i32 to index
      %c0_48 = arith.constant 0 : index
      %c0_49 = arith.constant 0 : index
      %167 = vector.load %arg2[%166, %c0_48, %c0_49] : memref<8x8x512xf32, #tpu.memory_space<vmem>>, vector<1x8x512xf32>
      %168 = vector.shape_cast %167 : vector<1x8x512xf32> to vector<8x512xf32>
      %c0_50 = arith.constant 0 : index
      %c0_51 = arith.constant 0 : index
      %169 = vector.load %arg5[%c0_50, %c0_51] : memref<128x512xf32, #tpu.memory_space<vmem>>, vector<128x512xf32>
      %cst_52 = arith.constant dense<0.000000e+00> : vector<8x512xf32>
      %170 = tpu.matmul %165, %169, %cst_52 {dimension_numbers = #tpu.dot_dimension_numbers<[1], [0], [0], [1], [0, 0, 1, 1], [], []>} : vector<8x128xf32>, vector<128x512xf32>, vector<8x512xf32> -> vector<8x512xf32>
      %171 = arith.addf %168, %170 : vector<8x512xf32>
      %172 = vector.extract_strided_slice %171 {offsets = [0, 0], sizes = [8, 128], strides = [1, 1]} : vector<8x512xf32> to vector<8x128xf32>
      %173 = arith.negf %172 : vector<8x128xf32>
      %174 = math.exp %173 : vector<8x128xf32>
      %cst_53 = arith.constant 1.000000e+00 : f32
      %175 = vector.broadcast %cst_53 : f32 to vector<8x128xf32>
      %176 = arith.addf %175, %174 : vector<8x128xf32>
      %177 = arith.divf %175, %176 : vector<8x128xf32>
      %178 = vector.extract_strided_slice %171 {offsets = [0, 128], sizes = [8, 128], strides = [1, 1]} : vector<8x512xf32> to vector<8x128xf32>
      %179 = arith.negf %178 : vector<8x128xf32>
      %180 = math.exp %179 : vector<8x128xf32>
      %cst_54 = arith.constant 1.000000e+00 : f32
      %181 = vector.broadcast %cst_54 : f32 to vector<8x128xf32>
      %182 = arith.addf %181, %180 : vector<8x128xf32>
      %183 = arith.divf %181, %182 : vector<8x128xf32>
      %184 = vector.extract_strided_slice %171 {offsets = [0, 256], sizes = [8, 128], strides = [1, 1]} : vector<8x512xf32> to vector<8x128xf32>
      %185 = math.tanh %184 : vector<8x128xf32>
      %186 = vector.extract_strided_slice %171 {offsets = [0, 384], sizes = [8, 128], strides = [1, 1]} : vector<8x512xf32> to vector<8x128xf32>
      %187 = arith.negf %186 : vector<8x128xf32>
      %188 = math.exp %187 : vector<8x128xf32>
      %cst_55 = arith.constant 1.000000e+00 : f32
      %189 = vector.broadcast %cst_55 : f32 to vector<8x128xf32>
      %190 = arith.addf %189, %188 : vector<8x128xf32>
      %191 = arith.divf %189, %190 : vector<8x128xf32>
      %192 = arith.mulf %183, %163 : vector<8x128xf32>
      %193 = arith.mulf %177, %185 : vector<8x128xf32>
      %194 = arith.addf %192, %193 : vector<8x128xf32>
      %195 = math.tanh %194 : vector<8x128xf32>
      %196 = arith.mulf %191, %195 : vector<8x128xf32>
      %c6_i32 = arith.constant 6 : i32
      %197 = arith.index_cast %c6_i32 : i32 to index
      %c0_56 = arith.constant 0 : index
      %c0_57 = arith.constant 0 : index
      %198 = vector.load %arg2[%197, %c0_56, %c0_57] : memref<8x8x512xf32, #tpu.memory_space<vmem>>, vector<1x8x512xf32>
      %199 = vector.shape_cast %198 : vector<1x8x512xf32> to vector<8x512xf32>
      %c0_58 = arith.constant 0 : index
      %c0_59 = arith.constant 0 : index
      %200 = vector.load %arg5[%c0_58, %c0_59] : memref<128x512xf32, #tpu.memory_space<vmem>>, vector<128x512xf32>
      %cst_60 = arith.constant dense<0.000000e+00> : vector<8x512xf32>
      %201 = tpu.matmul %196, %200, %cst_60 {dimension_numbers = #tpu.dot_dimension_numbers<[1], [0], [0], [1], [0, 0, 1, 1], [], []>} : vector<8x128xf32>, vector<128x512xf32>, vector<8x512xf32> -> vector<8x512xf32>
      %202 = arith.addf %199, %201 : vector<8x512xf32>
      %203 = vector.extract_strided_slice %202 {offsets = [0, 0], sizes = [8, 128], strides = [1, 1]} : vector<8x512xf32> to vector<8x128xf32>
      %204 = arith.negf %203 : vector<8x128xf32>
      %205 = math.exp %204 : vector<8x128xf32>
      %cst_61 = arith.constant 1.000000e+00 : f32
      %206 = vector.broadcast %cst_61 : f32 to vector<8x128xf32>
      %207 = arith.addf %206, %205 : vector<8x128xf32>
      %208 = arith.divf %206, %207 : vector<8x128xf32>
      %209 = vector.extract_strided_slice %202 {offsets = [0, 128], sizes = [8, 128], strides = [1, 1]} : vector<8x512xf32> to vector<8x128xf32>
      %210 = arith.negf %209 : vector<8x128xf32>
      %211 = math.exp %210 : vector<8x128xf32>
      %cst_62 = arith.constant 1.000000e+00 : f32
      %212 = vector.broadcast %cst_62 : f32 to vector<8x128xf32>
      %213 = arith.addf %212, %211 : vector<8x128xf32>
      %214 = arith.divf %212, %213 : vector<8x128xf32>
      %215 = vector.extract_strided_slice %202 {offsets = [0, 256], sizes = [8, 128], strides = [1, 1]} : vector<8x512xf32> to vector<8x128xf32>
      %216 = math.tanh %215 : vector<8x128xf32>
      %217 = vector.extract_strided_slice %202 {offsets = [0, 384], sizes = [8, 128], strides = [1, 1]} : vector<8x512xf32> to vector<8x128xf32>
      %218 = arith.negf %217 : vector<8x128xf32>
      %219 = math.exp %218 : vector<8x128xf32>
      %cst_63 = arith.constant 1.000000e+00 : f32
      %220 = vector.broadcast %cst_63 : f32 to vector<8x128xf32>
      %221 = arith.addf %220, %219 : vector<8x128xf32>
      %222 = arith.divf %220, %221 : vector<8x128xf32>
      %223 = arith.mulf %214, %194 : vector<8x128xf32>
      %224 = arith.mulf %208, %216 : vector<8x128xf32>
      %225 = arith.addf %223, %224 : vector<8x128xf32>
      %226 = math.tanh %225 : vector<8x128xf32>
      %227 = arith.mulf %222, %226 : vector<8x128xf32>
      %c7_i32 = arith.constant 7 : i32
      %228 = arith.index_cast %c7_i32 : i32 to index
      %c0_64 = arith.constant 0 : index
      %c0_65 = arith.constant 0 : index
      %229 = vector.load %arg2[%228, %c0_64, %c0_65] : memref<8x8x512xf32, #tpu.memory_space<vmem>>, vector<1x8x512xf32>
      %230 = vector.shape_cast %229 : vector<1x8x512xf32> to vector<8x512xf32>
      %c0_66 = arith.constant 0 : index
      %c0_67 = arith.constant 0 : index
      %231 = vector.load %arg5[%c0_66, %c0_67] : memref<128x512xf32, #tpu.memory_space<vmem>>, vector<128x512xf32>
      %cst_68 = arith.constant dense<0.000000e+00> : vector<8x512xf32>
      %232 = tpu.matmul %227, %231, %cst_68 {dimension_numbers = #tpu.dot_dimension_numbers<[1], [0], [0], [1], [0, 0, 1, 1], [], []>} : vector<8x128xf32>, vector<128x512xf32>, vector<8x512xf32> -> vector<8x512xf32>
      %233 = arith.addf %230, %232 : vector<8x512xf32>
      %234 = vector.extract_strided_slice %233 {offsets = [0, 0], sizes = [8, 128], strides = [1, 1]} : vector<8x512xf32> to vector<8x128xf32>
      %235 = arith.negf %234 : vector<8x128xf32>
      %236 = math.exp %235 : vector<8x128xf32>
      %cst_69 = arith.constant 1.000000e+00 : f32
      %237 = vector.broadcast %cst_69 : f32 to vector<8x128xf32>
      %238 = arith.addf %237, %236 : vector<8x128xf32>
      %239 = arith.divf %237, %238 : vector<8x128xf32>
      %240 = vector.extract_strided_slice %233 {offsets = [0, 128], sizes = [8, 128], strides = [1, 1]} : vector<8x512xf32> to vector<8x128xf32>
      %241 = arith.negf %240 : vector<8x128xf32>
      %242 = math.exp %241 : vector<8x128xf32>
      %cst_70 = arith.constant 1.000000e+00 : f32
      %243 = vector.broadcast %cst_70 : f32 to vector<8x128xf32>
      %244 = arith.addf %243, %242 : vector<8x128xf32>
      %245 = arith.divf %243, %244 : vector<8x128xf32>
      %246 = vector.extract_strided_slice %233 {offsets = [0, 256], sizes = [8, 128], strides = [1, 1]} : vector<8x512xf32> to vector<8x128xf32>
      %247 = math.tanh %246 : vector<8x128xf32>
      %248 = vector.extract_strided_slice %233 {offsets = [0, 384], sizes = [8, 128], strides = [1, 1]} : vector<8x512xf32> to vector<8x128xf32>
      %249 = arith.negf %248 : vector<8x128xf32>
      %250 = math.exp %249 : vector<8x128xf32>
      %cst_71 = arith.constant 1.000000e+00 : f32
      %251 = vector.broadcast %cst_71 : f32 to vector<8x128xf32>
      %252 = arith.addf %251, %250 : vector<8x128xf32>
      %253 = arith.divf %251, %252 : vector<8x128xf32>
      %254 = arith.mulf %245, %225 : vector<8x128xf32>
      %255 = arith.mulf %239, %247 : vector<8x128xf32>
      %256 = arith.addf %254, %255 : vector<8x128xf32>
      %257 = math.tanh %256 : vector<8x128xf32>
      %258 = arith.mulf %253, %257 : vector<8x128xf32>
      %c8_i32 = arith.constant 8 : i32
      %c0_72 = arith.constant 0 : index
      %c0_73 = arith.constant 0 : index
      %259 = vector.load %arg6[%c0_72, %c0_73] : memref<8x128xf32, #tpu.memory_space<vmem>>, vector<8x128xf32>
      tpu.vector_store %arg6[%c0_72, %c0_73], %258 {strides = array<i32>} : memref<8x128xf32, #tpu.memory_space<vmem>>, vector<8x128xf32>,
      %c0_74 = arith.constant 0 : index
      %c0_75 = arith.constant 0 : index
      %260 = vector.load %arg7[%c0_74, %c0_75] : memref<8x128xf32, #tpu.memory_space<vmem>>, vector<8x128xf32>
      tpu.vector_store %arg7[%c0_74, %c0_75], %256 {strides = array<i32>} : memref<8x128xf32, #tpu.memory_space<vmem>>, vector<8x128xf32>,
    } else {
    }
    %c0_i32_3 = arith.constant 0 : i32
    %6 = arith.cmpi eq, %arg1, %c0_i32_3 : i32
    %7 = arith.extui %6 : i1 to i32
    %c0_i32_4 = arith.constant 0 : i32
    %8 = arith.cmpi ne, %7, %c0_i32_4 : i32
    scf.if %8 {
      %c0 = arith.constant 0 : index
      %c0_5 = arith.constant 0 : index
      %9 = vector.load %arg6[%c0, %c0_5] : memref<8x128xf32, #tpu.memory_space<vmem>>, vector<8x128xf32>
      %c0_6 = arith.constant 0 : index
      %c0_7 = arith.constant 0 : index
      %10 = vector.load %arg7[%c0_6, %c0_7] : memref<8x128xf32, #tpu.memory_space<vmem>>, vector<8x128xf32>
      %c0_i32_8 = arith.constant 0 : i32
      %11 = arith.index_cast %c0_i32_8 : i32 to index
      %c0_9 = arith.constant 0 : index
      %c0_10 = arith.constant 0 : index
      %12 = vector.load %arg2[%11, %c0_9, %c0_10] : memref<8x8x512xf32, #tpu.memory_space<vmem>>, vector<1x8x512xf32>
      %13 = vector.shape_cast %12 : vector<1x8x512xf32> to vector<8x512xf32>
      %c0_11 = arith.constant 0 : index
      %c0_12 = arith.constant 0 : index
      %14 = vector.load %arg5[%c0_11, %c0_12] : memref<128x512xf32, #tpu.memory_space<vmem>>, vector<128x512xf32>
      %cst = arith.constant dense<0.000000e+00> : vector<8x512xf32>
      %15 = tpu.matmul %9, %14, %cst {dimension_numbers = #tpu.dot_dimension_numbers<[1], [0], [0], [1], [0, 0, 1, 1], [], []>} : vector<8x128xf32>, vector<128x512xf32>, vector<8x512xf32> -> vector<8x512xf32>
      %16 = arith.addf %13, %15 : vector<8x512xf32>
      %17 = vector.extract_strided_slice %16 {offsets = [0, 0], sizes = [8, 128], strides = [1, 1]} : vector<8x512xf32> to vector<8x128xf32>
      %18 = arith.negf %17 : vector<8x128xf32>
      %19 = math.exp %18 : vector<8x128xf32>
      %cst_13 = arith.constant 1.000000e+00 : f32
      %20 = vector.broadcast %cst_13 : f32 to vector<8x128xf32>
      %21 = arith.addf %20, %19 : vector<8x128xf32>
      %22 = arith.divf %20, %21 : vector<8x128xf32>
      %23 = vector.extract_strided_slice %16 {offsets = [0, 128], sizes = [8, 128], strides = [1, 1]} : vector<8x512xf32> to vector<8x128xf32>
      %24 = arith.negf %23 : vector<8x128xf32>
      %25 = math.exp %24 : vector<8x128xf32>
      %cst_14 = arith.constant 1.000000e+00 : f32
      %26 = vector.broadcast %cst_14 : f32 to vector<8x128xf32>
      %27 = arith.addf %26, %25 : vector<8x128xf32>
      %28 = arith.divf %26, %27 : vector<8x128xf32>
      %29 = vector.extract_strided_slice %16 {offsets = [0, 256], sizes = [8, 128], strides = [1, 1]} : vector<8x512xf32> to vector<8x128xf32>
      %30 = math.tanh %29 : vector<8x128xf32>
      %31 = vector.extract_strided_slice %16 {offsets = [0, 384], sizes = [8, 128], strides = [1, 1]} : vector<8x512xf32> to vector<8x128xf32>
      %32 = arith.negf %31 : vector<8x128xf32>
      %33 = math.exp %32 : vector<8x128xf32>
      %cst_15 = arith.constant 1.000000e+00 : f32
      %34 = vector.broadcast %cst_15 : f32 to vector<8x128xf32>
      %35 = arith.addf %34, %33 : vector<8x128xf32>
      %36 = arith.divf %34, %35 : vector<8x128xf32>
      %37 = arith.mulf %28, %10 : vector<8x128xf32>
      %38 = arith.mulf %22, %30 : vector<8x128xf32>
      %39 = arith.addf %37, %38 : vector<8x128xf32>
      %40 = math.tanh %39 : vector<8x128xf32>
      %41 = arith.mulf %36, %40 : vector<8x128xf32>
      %c1_i32 = arith.constant 1 : i32
      %42 = arith.index_cast %c1_i32 : i32 to index
      %c0_16 = arith.constant 0 : index
      %c0_17 = arith.constant 0 : index
      %43 = vector.load %arg2[%42, %c0_16, %c0_17] : memref<8x8x512xf32, #tpu.memory_space<vmem>>, vector<1x8x512xf32>
      %44 = vector.shape_cast %43 : vector<1x8x512xf32> to vector<8x512xf32>
      %c0_18 = arith.constant 0 : index
      %c0_19 = arith.constant 0 : index
      %45 = vector.load %arg5[%c0_18, %c0_19] : memref<128x512xf32, #tpu.memory_space<vmem>>, vector<128x512xf32>
      %cst_20 = arith.constant dense<0.000000e+00> : vector<8x512xf32>
      %46 = tpu.matmul %41, %45, %cst_20 {dimension_numbers = #tpu.dot_dimension_numbers<[1], [0], [0], [1], [0, 0, 1, 1], [], []>} : vector<8x128xf32>, vector<128x512xf32>, vector<8x512xf32> -> vector<8x512xf32>
      %47 = arith.addf %44, %46 : vector<8x512xf32>
      %48 = vector.extract_strided_slice %47 {offsets = [0, 0], sizes = [8, 128], strides = [1, 1]} : vector<8x512xf32> to vector<8x128xf32>
      %49 = arith.negf %48 : vector<8x128xf32>
      %50 = math.exp %49 : vector<8x128xf32>
      %cst_21 = arith.constant 1.000000e+00 : f32
      %51 = vector.broadcast %cst_21 : f32 to vector<8x128xf32>
      %52 = arith.addf %51, %50 : vector<8x128xf32>
      %53 = arith.divf %51, %52 : vector<8x128xf32>
      %54 = vector.extract_strided_slice %47 {offsets = [0, 128], sizes = [8, 128], strides = [1, 1]} : vector<8x512xf32> to vector<8x128xf32>
      %55 = arith.negf %54 : vector<8x128xf32>
      %56 = math.exp %55 : vector<8x128xf32>
      %cst_22 = arith.constant 1.000000e+00 : f32
      %57 = vector.broadcast %cst_22 : f32 to vector<8x128xf32>
      %58 = arith.addf %57, %56 : vector<8x128xf32>
      %59 = arith.divf %57, %58 : vector<8x128xf32>
      %60 = vector.extract_strided_slice %47 {offsets = [0, 256], sizes = [8, 128], strides = [1, 1]} : vector<8x512xf32> to vector<8x128xf32>
      %61 = math.tanh %60 : vector<8x128xf32>
      %62 = vector.extract_strided_slice %47 {offsets = [0, 384], sizes = [8, 128], strides = [1, 1]} : vector<8x512xf32> to vector<8x128xf32>
      %63 = arith.negf %62 : vector<8x128xf32>
      %64 = math.exp %63 : vector<8x128xf32>
      %cst_23 = arith.constant 1.000000e+00 : f32
      %65 = vector.broadcast %cst_23 : f32 to vector<8x128xf32>
      %66 = arith.addf %65, %64 : vector<8x128xf32>
      %67 = arith.divf %65, %66 : vector<8x128xf32>
      %68 = arith.mulf %59, %39 : vector<8x128xf32>
      %69 = arith.mulf %53, %61 : vector<8x128xf32>
      %70 = arith.addf %68, %69 : vector<8x128xf32>
      %71 = math.tanh %70 : vector<8x128xf32>
      %72 = arith.mulf %67, %71 : vector<8x128xf32>
      %c2_i32 = arith.constant 2 : i32
      %73 = arith.index_cast %c2_i32 : i32 to index
      %c0_24 = arith.constant 0 : index
      %c0_25 = arith.constant 0 : index
      %74 = vector.load %arg2[%73, %c0_24, %c0_25] : memref<8x8x512xf32, #tpu.memory_space<vmem>>, vector<1x8x512xf32>
      %75 = vector.shape_cast %74 : vector<1x8x512xf32> to vector<8x512xf32>
      %c0_26 = arith.constant 0 : index
      %c0_27 = arith.constant 0 : index
      %76 = vector.load %arg5[%c0_26, %c0_27] : memref<128x512xf32, #tpu.memory_space<vmem>>, vector<128x512xf32>
      %cst_28 = arith.constant dense<0.000000e+00> : vector<8x512xf32>
      %77 = tpu.matmul %72, %76, %cst_28 {dimension_numbers = #tpu.dot_dimension_numbers<[1], [0], [0], [1], [0, 0, 1, 1], [], []>} : vector<8x128xf32>, vector<128x512xf32>, vector<8x512xf32> -> vector<8x512xf32>
      %78 = arith.addf %75, %77 : vector<8x512xf32>
      %79 = vector.extract_strided_slice %78 {offsets = [0, 0], sizes = [8, 128], strides = [1, 1]} : vector<8x512xf32> to vector<8x128xf32>
      %80 = arith.negf %79 : vector<8x128xf32>
      %81 = math.exp %80 : vector<8x128xf32>
      %cst_29 = arith.constant 1.000000e+00 : f32
      %82 = vector.broadcast %cst_29 : f32 to vector<8x128xf32>
      %83 = arith.addf %82, %81 : vector<8x128xf32>
      %84 = arith.divf %82, %83 : vector<8x128xf32>
      %85 = vector.extract_strided_slice %78 {offsets = [0, 128], sizes = [8, 128], strides = [1, 1]} : vector<8x512xf32> to vector<8x128xf32>
      %86 = arith.negf %85 : vector<8x128xf32>
      %87 = math.exp %86 : vector<8x128xf32>
      %cst_30 = arith.constant 1.000000e+00 : f32
      %88 = vector.broadcast %cst_30 : f32 to vector<8x128xf32>
      %89 = arith.addf %88, %87 : vector<8x128xf32>
      %90 = arith.divf %88, %89 : vector<8x128xf32>
      %91 = vector.extract_strided_slice %78 {offsets = [0, 256], sizes = [8, 128], strides = [1, 1]} : vector<8x512xf32> to vector<8x128xf32>
      %92 = math.tanh %91 : vector<8x128xf32>
      %93 = vector.extract_strided_slice %78 {offsets = [0, 384], sizes = [8, 128], strides = [1, 1]} : vector<8x512xf32> to vector<8x128xf32>
      %94 = arith.negf %93 : vector<8x128xf32>
      %95 = math.exp %94 : vector<8x128xf32>
      %cst_31 = arith.constant 1.000000e+00 : f32
      %96 = vector.broadcast %cst_31 : f32 to vector<8x128xf32>
      %97 = arith.addf %96, %95 : vector<8x128xf32>
      %98 = arith.divf %96, %97 : vector<8x128xf32>
      %99 = arith.mulf %90, %70 : vector<8x128xf32>
      %100 = arith.mulf %84, %92 : vector<8x128xf32>
      %101 = arith.addf %99, %100 : vector<8x128xf32>
      %102 = math.tanh %101 : vector<8x128xf32>
      %103 = arith.mulf %98, %102 : vector<8x128xf32>
      %c3_i32 = arith.constant 3 : i32
      %104 = arith.index_cast %c3_i32 : i32 to index
      %c0_32 = arith.constant 0 : index
      %c0_33 = arith.constant 0 : index
      %105 = vector.load %arg2[%104, %c0_32, %c0_33] : memref<8x8x512xf32, #tpu.memory_space<vmem>>, vector<1x8x512xf32>
      %106 = vector.shape_cast %105 : vector<1x8x512xf32> to vector<8x512xf32>
      %c0_34 = arith.constant 0 : index
      %c0_35 = arith.constant 0 : index
      %107 = vector.load %arg5[%c0_34, %c0_35] : memref<128x512xf32, #tpu.memory_space<vmem>>, vector<128x512xf32>
      %cst_36 = arith.constant dense<0.000000e+00> : vector<8x512xf32>
      %108 = tpu.matmul %103, %107, %cst_36 {dimension_numbers = #tpu.dot_dimension_numbers<[1], [0], [0], [1], [0, 0, 1, 1], [], []>} : vector<8x128xf32>, vector<128x512xf32>, vector<8x512xf32> -> vector<8x512xf32>
      %109 = arith.addf %106, %108 : vector<8x512xf32>
      %110 = vector.extract_strided_slice %109 {offsets = [0, 0], sizes = [8, 128], strides = [1, 1]} : vector<8x512xf32> to vector<8x128xf32>
      %111 = arith.negf %110 : vector<8x128xf32>
      %112 = math.exp %111 : vector<8x128xf32>
      %cst_37 = arith.constant 1.000000e+00 : f32
      %113 = vector.broadcast %cst_37 : f32 to vector<8x128xf32>
      %114 = arith.addf %113, %112 : vector<8x128xf32>
      %115 = arith.divf %113, %114 : vector<8x128xf32>
      %116 = vector.extract_strided_slice %109 {offsets = [0, 128], sizes = [8, 128], strides = [1, 1]} : vector<8x512xf32> to vector<8x128xf32>
      %117 = arith.negf %116 : vector<8x128xf32>
      %118 = math.exp %117 : vector<8x128xf32>
      %cst_38 = arith.constant 1.000000e+00 : f32
      %119 = vector.broadcast %cst_38 : f32 to vector<8x128xf32>
      %120 = arith.addf %119, %118 : vector<8x128xf32>
      %121 = arith.divf %119, %120 : vector<8x128xf32>
      %122 = vector.extract_strided_slice %109 {offsets = [0, 256], sizes = [8, 128], strides = [1, 1]} : vector<8x512xf32> to vector<8x128xf32>
      %123 = math.tanh %122 : vector<8x128xf32>
      %124 = vector.extract_strided_slice %109 {offsets = [0, 384], sizes = [8, 128], strides = [1, 1]} : vector<8x512xf32> to vector<8x128xf32>
      %125 = arith.negf %124 : vector<8x128xf32>
      %126 = math.exp %125 : vector<8x128xf32>
      %cst_39 = arith.constant 1.000000e+00 : f32
      %127 = vector.broadcast %cst_39 : f32 to vector<8x128xf32>
      %128 = arith.addf %127, %126 : vector<8x128xf32>
      %129 = arith.divf %127, %128 : vector<8x128xf32>
      %130 = arith.mulf %121, %101 : vector<8x128xf32>
      %131 = arith.mulf %115, %123 : vector<8x128xf32>
      %132 = arith.addf %130, %131 : vector<8x128xf32>
      %133 = math.tanh %132 : vector<8x128xf32>
      %134 = arith.mulf %129, %133 : vector<8x128xf32>
      %c4_i32 = arith.constant 4 : i32
      %135 = arith.index_cast %c4_i32 : i32 to index
      %c0_40 = arith.constant 0 : index
      %c0_41 = arith.constant 0 : index
      %136 = vector.load %arg2[%135, %c0_40, %c0_41] : memref<8x8x512xf32, #tpu.memory_space<vmem>>, vector<1x8x512xf32>
      %137 = vector.shape_cast %136 : vector<1x8x512xf32> to vector<8x512xf32>
      %c0_42 = arith.constant 0 : index
      %c0_43 = arith.constant 0 : index
      %138 = vector.load %arg5[%c0_42, %c0_43] : memref<128x512xf32, #tpu.memory_space<vmem>>, vector<128x512xf32>
      %cst_44 = arith.constant dense<0.000000e+00> : vector<8x512xf32>
      %139 = tpu.matmul %134, %138, %cst_44 {dimension_numbers = #tpu.dot_dimension_numbers<[1], [0], [0], [1], [0, 0, 1, 1], [], []>} : vector<8x128xf32>, vector<128x512xf32>, vector<8x512xf32> -> vector<8x512xf32>
      %140 = arith.addf %137, %139 : vector<8x512xf32>
      %141 = vector.extract_strided_slice %140 {offsets = [0, 0], sizes = [8, 128], strides = [1, 1]} : vector<8x512xf32> to vector<8x128xf32>
      %142 = arith.negf %141 : vector<8x128xf32>
      %143 = math.exp %142 : vector<8x128xf32>
      %cst_45 = arith.constant 1.000000e+00 : f32
      %144 = vector.broadcast %cst_45 : f32 to vector<8x128xf32>
      %145 = arith.addf %144, %143 : vector<8x128xf32>
      %146 = arith.divf %144, %145 : vector<8x128xf32>
      %147 = vector.extract_strided_slice %140 {offsets = [0, 128], sizes = [8, 128], strides = [1, 1]} : vector<8x512xf32> to vector<8x128xf32>
      %148 = arith.negf %147 : vector<8x128xf32>
      %149 = math.exp %148 : vector<8x128xf32>
      %cst_46 = arith.constant 1.000000e+00 : f32
      %150 = vector.broadcast %cst_46 : f32 to vector<8x128xf32>
      %151 = arith.addf %150, %149 : vector<8x128xf32>
      %152 = arith.divf %150, %151 : vector<8x128xf32>
      %153 = vector.extract_strided_slice %140 {offsets = [0, 256], sizes = [8, 128], strides = [1, 1]} : vector<8x512xf32> to vector<8x128xf32>
      %154 = math.tanh %153 : vector<8x128xf32>
      %155 = vector.extract_strided_slice %140 {offsets = [0, 384], sizes = [8, 128], strides = [1, 1]} : vector<8x512xf32> to vector<8x128xf32>
      %156 = arith.negf %155 : vector<8x128xf32>
      %157 = math.exp %156 : vector<8x128xf32>
      %cst_47 = arith.constant 1.000000e+00 : f32
      %158 = vector.broadcast %cst_47 : f32 to vector<8x128xf32>
      %159 = arith.addf %158, %157 : vector<8x128xf32>
      %160 = arith.divf %158, %159 : vector<8x128xf32>
      %161 = arith.mulf %152, %132 : vector<8x128xf32>
      %162 = arith.mulf %146, %154 : vector<8x128xf32>
      %163 = arith.addf %161, %162 : vector<8x128xf32>
      %164 = math.tanh %163 : vector<8x128xf32>
      %165 = arith.mulf %160, %164 : vector<8x128xf32>
      %c5_i32 = arith.constant 5 : i32
      %166 = arith.index_cast %c5_i32 : i32 to index
      %c0_48 = arith.constant 0 : index
      %c0_49 = arith.constant 0 : index
      %167 = vector.load %arg2[%166, %c0_48, %c0_49] : memref<8x8x512xf32, #tpu.memory_space<vmem>>, vector<1x8x512xf32>
      %168 = vector.shape_cast %167 : vector<1x8x512xf32> to vector<8x512xf32>
      %c0_50 = arith.constant 0 : index
      %c0_51 = arith.constant 0 : index
      %169 = vector.load %arg5[%c0_50, %c0_51] : memref<128x512xf32, #tpu.memory_space<vmem>>, vector<128x512xf32>
      %cst_52 = arith.constant dense<0.000000e+00> : vector<8x512xf32>
      %170 = tpu.matmul %165, %169, %cst_52 {dimension_numbers = #tpu.dot_dimension_numbers<[1], [0], [0], [1], [0, 0, 1, 1], [], []>} : vector<8x128xf32>, vector<128x512xf32>, vector<8x512xf32> -> vector<8x512xf32>
      %171 = arith.addf %168, %170 : vector<8x512xf32>
      %172 = vector.extract_strided_slice %171 {offsets = [0, 0], sizes = [8, 128], strides = [1, 1]} : vector<8x512xf32> to vector<8x128xf32>
      %173 = arith.negf %172 : vector<8x128xf32>
      %174 = math.exp %173 : vector<8x128xf32>
      %cst_53 = arith.constant 1.000000e+00 : f32
      %175 = vector.broadcast %cst_53 : f32 to vector<8x128xf32>
      %176 = arith.addf %175, %174 : vector<8x128xf32>
      %177 = arith.divf %175, %176 : vector<8x128xf32>
      %178 = vector.extract_strided_slice %171 {offsets = [0, 128], sizes = [8, 128], strides = [1, 1]} : vector<8x512xf32> to vector<8x128xf32>
      %179 = arith.negf %178 : vector<8x128xf32>
      %180 = math.exp %179 : vector<8x128xf32>
      %cst_54 = arith.constant 1.000000e+00 : f32
      %181 = vector.broadcast %cst_54 : f32 to vector<8x128xf32>
      %182 = arith.addf %181, %180 : vector<8x128xf32>
      %183 = arith.divf %181, %182 : vector<8x128xf32>
      %184 = vector.extract_strided_slice %171 {offsets = [0, 256], sizes = [8, 128], strides = [1, 1]} : vector<8x512xf32> to vector<8x128xf32>
      %185 = math.tanh %184 : vector<8x128xf32>
      %186 = vector.extract_strided_slice %171 {offsets = [0, 384], sizes = [8, 128], strides = [1, 1]} : vector<8x512xf32> to vector<8x128xf32>
      %187 = arith.negf %186 : vector<8x128xf32>
      %188 = math.exp %187 : vector<8x128xf32>
      %cst_55 = arith.constant 1.000000e+00 : f32
      %189 = vector.broadcast %cst_55 : f32 to vector<8x128xf32>
      %190 = arith.addf %189, %188 : vector<8x128xf32>
      %191 = arith.divf %189, %190 : vector<8x128xf32>
      %192 = arith.mulf %183, %163 : vector<8x128xf32>
      %193 = arith.mulf %177, %185 : vector<8x128xf32>
      %194 = arith.addf %192, %193 : vector<8x128xf32>
      %195 = math.tanh %194 : vector<8x128xf32>
      %196 = arith.mulf %191, %195 : vector<8x128xf32>
      %c6_i32 = arith.constant 6 : i32
      %197 = arith.index_cast %c6_i32 : i32 to index
      %c0_56 = arith.constant 0 : index
      %c0_57 = arith.constant 0 : index
      %198 = vector.load %arg2[%197, %c0_56, %c0_57] : memref<8x8x512xf32, #tpu.memory_space<vmem>>, vector<1x8x512xf32>
      %199 = vector.shape_cast %198 : vector<1x8x512xf32> to vector<8x512xf32>
      %c0_58 = arith.constant 0 : index
      %c0_59 = arith.constant 0 : index
      %200 = vector.load %arg5[%c0_58, %c0_59] : memref<128x512xf32, #tpu.memory_space<vmem>>, vector<128x512xf32>
      %cst_60 = arith.constant dense<0.000000e+00> : vector<8x512xf32>
      %201 = tpu.matmul %196, %200, %cst_60 {dimension_numbers = #tpu.dot_dimension_numbers<[1], [0], [0], [1], [0, 0, 1, 1], [], []>} : vector<8x128xf32>, vector<128x512xf32>, vector<8x512xf32> -> vector<8x512xf32>
      %202 = arith.addf %199, %201 : vector<8x512xf32>
      %203 = vector.extract_strided_slice %202 {offsets = [0, 0], sizes = [8, 128], strides = [1, 1]} : vector<8x512xf32> to vector<8x128xf32>
      %204 = arith.negf %203 : vector<8x128xf32>
      %205 = math.exp %204 : vector<8x128xf32>
      %cst_61 = arith.constant 1.000000e+00 : f32
      %206 = vector.broadcast %cst_61 : f32 to vector<8x128xf32>
      %207 = arith.addf %206, %205 : vector<8x128xf32>
      %208 = arith.divf %206, %207 : vector<8x128xf32>
      %209 = vector.extract_strided_slice %202 {offsets = [0, 128], sizes = [8, 128], strides = [1, 1]} : vector<8x512xf32> to vector<8x128xf32>
      %210 = arith.negf %209 : vector<8x128xf32>
      %211 = math.exp %210 : vector<8x128xf32>
      %cst_62 = arith.constant 1.000000e+00 : f32
      %212 = vector.broadcast %cst_62 : f32 to vector<8x128xf32>
      %213 = arith.addf %212, %211 : vector<8x128xf32>
      %214 = arith.divf %212, %213 : vector<8x128xf32>
      %215 = vector.extract_strided_slice %202 {offsets = [0, 256], sizes = [8, 128], strides = [1, 1]} : vector<8x512xf32> to vector<8x128xf32>
      %216 = math.tanh %215 : vector<8x128xf32>
      %217 = vector.extract_strided_slice %202 {offsets = [0, 384], sizes = [8, 128], strides = [1, 1]} : vector<8x512xf32> to vector<8x128xf32>
      %218 = arith.negf %217 : vector<8x128xf32>
      %219 = math.exp %218 : vector<8x128xf32>
      %cst_63 = arith.constant 1.000000e+00 : f32
      %220 = vector.broadcast %cst_63 : f32 to vector<8x128xf32>
      %221 = arith.addf %220, %219 : vector<8x128xf32>
      %222 = arith.divf %220, %221 : vector<8x128xf32>
      %223 = arith.mulf %214, %194 : vector<8x128xf32>
      %224 = arith.mulf %208, %216 : vector<8x128xf32>
      %225 = arith.addf %223, %224 : vector<8x128xf32>
      %226 = math.tanh %225 : vector<8x128xf32>
      %227 = arith.mulf %222, %226 : vector<8x128xf32>
      %c7_i32 = arith.constant 7 : i32
      %228 = arith.index_cast %c7_i32 : i32 to index
      %c0_64 = arith.constant 0 : index
      %c0_65 = arith.constant 0 : index
      %229 = vector.load %arg2[%228, %c0_64, %c0_65] : memref<8x8x512xf32, #tpu.memory_space<vmem>>, vector<1x8x512xf32>
      %230 = vector.shape_cast %229 : vector<1x8x512xf32> to vector<8x512xf32>
      %c0_66 = arith.constant 0 : index
      %c0_67 = arith.constant 0 : index
      %231 = vector.load %arg5[%c0_66, %c0_67] : memref<128x512xf32, #tpu.memory_space<vmem>>, vector<128x512xf32>
      %cst_68 = arith.constant dense<0.000000e+00> : vector<8x512xf32>
      %232 = tpu.matmul %227, %231, %cst_68 {dimension_numbers = #tpu.dot_dimension_numbers<[1], [0], [0], [1], [0, 0, 1, 1], [], []>} : vector<8x128xf32>, vector<128x512xf32>, vector<8x512xf32> -> vector<8x512xf32>
      %233 = arith.addf %230, %232 : vector<8x512xf32>
      %234 = vector.extract_strided_slice %233 {offsets = [0, 0], sizes = [8, 128], strides = [1, 1]} : vector<8x512xf32> to vector<8x128xf32>
      %235 = arith.negf %234 : vector<8x128xf32>
      %236 = math.exp %235 : vector<8x128xf32>
      %cst_69 = arith.constant 1.000000e+00 : f32
      %237 = vector.broadcast %cst_69 : f32 to vector<8x128xf32>
      %238 = arith.addf %237, %236 : vector<8x128xf32>
      %239 = arith.divf %237, %238 : vector<8x128xf32>
      %240 = vector.extract_strided_slice %233 {offsets = [0, 128], sizes = [8, 128], strides = [1, 1]} : vector<8x512xf32> to vector<8x128xf32>
      %241 = arith.negf %240 : vector<8x128xf32>
      %242 = math.exp %241 : vector<8x128xf32>
      %cst_70 = arith.constant 1.000000e+00 : f32
      %243 = vector.broadcast %cst_70 : f32 to vector<8x128xf32>
      %244 = arith.addf %243, %242 : vector<8x128xf32>
      %245 = arith.divf %243, %244 : vector<8x128xf32>
      %246 = vector.extract_strided_slice %233 {offsets = [0, 256], sizes = [8, 128], strides = [1, 1]} : vector<8x512xf32> to vector<8x128xf32>
      %247 = math.tanh %246 : vector<8x128xf32>
      %248 = vector.extract_strided_slice %233 {offsets = [0, 384], sizes = [8, 128], strides = [1, 1]} : vector<8x512xf32> to vector<8x128xf32>
      %249 = arith.negf %248 : vector<8x128xf32>
      %250 = math.exp %249 : vector<8x128xf32>
      %cst_71 = arith.constant 1.000000e+00 : f32
      %251 = vector.broadcast %cst_71 : f32 to vector<8x128xf32>
      %252 = arith.addf %251, %250 : vector<8x128xf32>
      %253 = arith.divf %251, %252 : vector<8x128xf32>
      %254 = arith.mulf %245, %225 : vector<8x128xf32>
      %255 = arith.mulf %239, %247 : vector<8x128xf32>
      %256 = arith.addf %254, %255 : vector<8x128xf32>
      %257 = math.tanh %256 : vector<8x128xf32>
      %258 = arith.mulf %253, %257 : vector<8x128xf32>
      %c8_i32 = arith.constant 8 : i32
      %c0_72 = arith.constant 0 : index
      %c0_73 = arith.constant 0 : index
      %259 = vector.load %arg6[%c0_72, %c0_73] : memref<8x128xf32, #tpu.memory_space<vmem>>, vector<8x128xf32>
      tpu.vector_store %arg6[%c0_72, %c0_73], %258 {strides = array<i32>} : memref<8x128xf32, #tpu.memory_space<vmem>>, vector<8x128xf32>,
      %c0_74 = arith.constant 0 : index
      %c0_75 = arith.constant 0 : index
      %260 = vector.load %arg7[%c0_74, %c0_75] : memref<8x128xf32, #tpu.memory_space<vmem>>, vector<8x128xf32>
      tpu.vector_store %arg7[%c0_74, %c0_75], %256 {strides = array<i32>} : memref<8x128xf32, #tpu.memory_space<vmem>>, vector<8x128xf32>,
      %c0_76 = arith.constant 0 : index
      %c0_77 = arith.constant 0 : index
      %261 = vector.load %arg4[%c0_76, %c0_77] : memref<8x128xf32, #tpu.memory_space<vmem>>, vector<8x128xf32>
      tpu.vector_store %arg4[%c0_76, %c0_77], %258 {strides = array<i32>} : memref<8x128xf32, #tpu.memory_space<vmem>>, vector<8x128xf32>,
    } else {
    }
    return
  }
  func.func @transform_0(%arg0: i32, %arg1: i32) -> (i32, i32, i32) {
    %c0_i32 = arith.constant 0 : i32
    %c0_i32_0 = arith.constant 0 : i32
    return %arg1, %arg0, %c0_i32 : i32, i32, i32
  }
  func.func @transform_2(%arg0: i32, %arg1: i32) -> (i32, i32) {
    %c0_i32 = arith.constant 0 : i32
    %c0_i32_0 = arith.constant 0 : i32
    return %arg0, %c0_i32 : i32, i32
  }
}

</mosaic_0001>

<bundles_post_ra>
// kernel: tpu_custom_call.1
= control target key start
LH: loop header
LB: loop body
LE: loop exit
PB: predicated region body
PF: predicated region fallthrough
CT: control target
= control target key end

     0   :  { %7 = vsyncpa [#allocation7], 0  ;;  %s4194_s0 = inlined_call_operand.hbm [shape: f32[8,8,512], index: 0, kind: input, shape index: {}]   ;;  %s4195_s1 = inlined_call_operand.hbm [shape: f32[128,512], index: 1, kind: input, shape index: {}]   ;;  %s4196_s2 = inlined_call_operand.hbm [shape: f32[8,128], index: 2, kind: output, shape index: {}]  }
   0x1   :  { %8 = vsyncpa [#allocation8], 0  ;;  %s3775_s9 = smov [#allocation6]   ;;  %s3703_s13 = scalar_lea.hbm %s4194_s0, 4096 }
   0x2   :  { %s14_s10 = sshll.u32 %s3775_s9, 4  ;;  %p3704_p0 = scmp.ne.s32.totalorder %s4194_s0, %s3703_s13  ;;  %s15_s10 = int_to_ptr.vmem [resolvable:$true] %s14_s10 }
   0x3   :  { %p3707_p1 = scmp.lt.u32.totalorder %s3703_s13, %s4194_s0 }
   0x5   :  { %p3709_p2 = pnand %p3707_p1, %p3704_p0 }
   0x7   :  { %3712 = shalt.err (!%p3709_p2)
}
   0x8   :  { %s3713_s18 = scalar_lea.vmem %s15_s10, 4096  ;;  %p3718_p4 = scmp.lt.s32.totalorder %s15_s10, %s15_s10 }
   0x9   :  { %p3714_p3 = scmp.ne.s32.totalorder %s15_s10, %s3713_s18  ;;  %p3719_p5 = scmp.lt.s32.totalorder %s3713_s18, %s3713_s18 }
   0xb   :  { %p3720_p6 = por %p3719_p5, %p3718_p4 }
   0xd   :  { %p3721_p7 = pnand %p3720_p6, %p3714_p3 }
   0xf   :  { %3724 = shalt.err (!%p3721_p7)
}
  0x10   :  { %s3776_s19 = smov 512   ;;  %s3777_s20 = smov 32  }
  0x11   :  { %20 = dma.hbm_to_vmem [thread:$0]  %s4194_s0, 4096, %s15_s10, [#allocation7], %s3776_s19, %s3776_s19, %s3777_s20  }
  0x12   :  { %3769 = dma.done.wait [#allocation7], 4096  }
  0x13   :  { %3770 = vsyncadd [#allocation7], 4294963200  ;;  %s3778_s23 = smov [#allocation2]   ;;  %s3725_s27 = scalar_lea.hbm %s4195_s1, 8192 }
  0x14   :  { %s35_s24 = sshll.u32 %s3778_s23, 4  ;;  %p3726_p8 = scmp.ne.s32.totalorder %s4195_s1, %s3725_s27  ;;  %s36_s24 = int_to_ptr.vmem [resolvable:$true] %s35_s24 }
  0x15   :  { %p3729_p9 = scmp.lt.u32.totalorder %s3725_s27, %s4195_s1 }
  0x17   :  { %p3731_p10 = pnand %p3729_p9, %p3726_p8 }
  0x19   :  { %3734 = shalt.err (!%p3731_p10)  }
  0x1a   :  { %s3735_s0 = scalar_lea.vmem %s36_s24, 8192  ;;  %p3740_p12 = scmp.lt.s32.totalorder %s36_s24, %s36_s24 }
  0x1b   :  { %p3736_p11 = scmp.ne.s32.totalorder %s36_s24, %s3735_s0  ;;  %p3741_p13 = scmp.lt.s32.totalorder %s3735_s0, %s3735_s0 }
  0x1d   :  { %p3742_p0 = por %p3741_p13, %p3740_p12 }
  0x1f   :  { %p3743_p1 = pnand %p3742_p0, %p3736_p11 }
  0x21   :  { %3746 = shalt.err (!%p3743_p1)  }
  0x22   :  { %38 = dma.hbm_to_vmem [thread:$0]  %s4195_s1, 8192, %s36_s24, [#allocation5] }
  0x23   :  { %3771 = dma.done.wait [#allocation5], 8192 }
  0x24   :  { %3772 = vsyncadd [#allocation5], 4294959104  ;;  %v3779_v0 = vmov 0.0   ;;  %v1526_v1 = vld [vmem:[#allocation2 + $0x8] sm:$0xff]  ;;  %v1525_v3 = vld [vmem:[#allocation2] sm:$0xff]  ;;  %s3780_s1 = smov [#allocation9]  }
  0x25   :  { %1653 = vmatprep.mubr.f32.mxu0 %v3779_v0  ;;  %1724 = vmatprep.mubr.f32.mxu1 %v3779_v0  ;;  %v1530_v2 = vld [vmem:[#allocation2 + $0x28] sm:$0xff]  ;;  %v1529_v5 = vld [vmem:[#allocation2 + $0x20] sm:$0xff]  ;;  %v1528_v19 = vld [vmem:[#allocation2 + $0x18] sm:$0xff]  ;;  %s2993_s6 = sshll.u32 %s3780_s1, 4  ;;  %s2994_s6 = int_to_ptr.vmem [resolvable:$true] %s2993_s6 }
  0x26   :  { %v3822_v4 = vpack.c.bf16 %v1530_v2, %v1526_v1  ;;  %v1534_v6 = vld [vmem:[#allocation2 + $0x48] sm:$0xff]  ;;  %v3824_v8 = vpack.c.bf16 %v1529_v5, %v1525_v3  ;;  %v1533_v10 = vld [vmem:[#allocation2 + $0x40] sm:$0xff]  ;;  %v1532_v20 = vld [vmem:[#allocation2 + $0x38] sm:$0xff]  ;;  %s3747_s7 = scalar_lea.vmem %s2994_s6, 128  ;;  %p3752_p3 = scmp.lt.s32.totalorder %s2994_s6, %s2994_s6 }
  0x27   :  { %v1538_v7 = vld [vmem:[#allocation2 + $0x68] sm:$0xff]  ;;  %v1537_v11 = vld [vmem:[#allocation2 + $0x60] sm:$0xff]  ;;  %v3835_v22 = vpack.c.bf16 %v1532_v20, %v1528_v19  ;;  %v1527_v23 = vld [vmem:[#allocation2 + $0x10] sm:$0xff]  ;;  %p3748_p2 = scmp.ne.s32.totalorder %s2994_s6, %s3747_s7  ;;  %p3753_p4 = scmp.lt.s32.totalorder %s3747_s7, %s3747_s7 }
  0x28   :  { %v3826_v9 = vpack.c.bf16 %v1538_v7, %v1534_v6  ;;  %v1542_v12 = vld [vmem:[#allocation2 + $0x88] sm:$0xff]  ;;  %3058 = vmatprep.subr.bf16.mxu0 %v3822_v4  ;;  %v3830_v14 = vpack.c.bf16 %v1537_v11, %v1533_v10  ;;  %v1541_v15 = vld [vmem:[#allocation2 + $0x80] sm:$0xff]  ;;  %v1531_v24 = vld [vmem:[#allocation2 + $0x30] sm:$0xff] }
  0x29   :  { %v1546_v13 = vld [vmem:[#allocation2 + $0xa8] sm:$0xff]  ;;  %3060 = vmatpush1.bf16.msra.mxu0 %v3824_v8  ;;  %v1545_v16 = vld [vmem:[#allocation2 + $0xa0] sm:$0xff]  ;;  %v3837_v25 = vpack.c.bf16 %v1531_v24, %v1527_v23  ;;  %3090 = vmatprep.subr.bf16.mxu1 %v3835_v22  ;;  %v1536_v27 = vld [vmem:[#allocation2 + $0x58] sm:$0xff]  ;;  %p3754_p5 = por %p3753_p4, %p3752_p3 }
  0x2a   :  { %3062 = vmatprep.subr.bf16.mxu0 %v3826_v9  ;;  %v3833_v17 = vpack.c.bf16 %v1546_v13, %v1542_v12  ;;  %v1550_v18 = vld [vmem:[#allocation2 + $0xc8] sm:$0xff]  ;;  %v3840_v26 = vpack.c.bf16 %v1545_v16, %v1541_v15  ;;  %v1540_v28 = vld [vmem:[#allocation2 + $0x78] sm:$0xff]  ;;  %v1535_v29 = vld [vmem:[#allocation2 + $0x50] sm:$0xff] }
  0x2b   :  { %v1554_v21 = vld [vmem:[#allocation2 + $0xe8] sm:$0xff]  ;;  %v1549_v31 = vld [vmem:[#allocation2 + $0xc0] sm:$0xff]  ;;  %3092 = vmatpush1.bf16.msra.mxu1 %v3837_v25  ;;  %v3847_v33 = vpack.c.bf16 %v1540_v28, %v1536_v27  ;;  %v1539_v34 = vld [vmem:[#allocation2 + $0x70] sm:$0xff]  ;;  %p3755_p6 = pnand %p3754_p5, %p3748_p2 }
  0x2c   :  { %v3844_v30 = vpack.c.bf16 %v1554_v21, %v1550_v18  ;;  %v1553_v32 = vld [vmem:[#allocation2 + $0xe0] sm:$0xff]  ;;  %v1558_v35 = vld [vmem:[#allocation2 + $0x108] sm:$0xff]  ;;  %v3849_v37 = vpack.c.bf16 %v1539_v34, %v1535_v29  ;;  %v1544_v38 = vld [vmem:[#allocation2 + $0x98] sm:$0xff] }
  0x2d   :  { %3064 = vmatpush1.bf16.msra.mxu0 %v3830_v14  ;;  %v1562_v36 = vld [vmem:[#allocation2 + $0x128] sm:$0xff]  ;;  %3094 = vmatprep.subr.bf16.mxu1 %v3847_v33  ;;  %v1548_v39 = vld [vmem:[#allocation2 + $0xb8] sm:$0xff]  ;;  %v1543_v40 = vld [vmem:[#allocation2 + $0x90] sm:$0xff]  ;;  %v3853_v42 = vpack.c.bf16 %v1553_v32, %v1549_v31 }
  0x2e   :  { %3066 = vmatprep.subr.bf16.mxu0 %v3833_v17  ;;  %v1547_v41 = vld [vmem:[#allocation2 + $0xb0] sm:$0xff]  ;;  %v1557_v43 = vld [vmem:[#allocation2 + $0x100] sm:$0xff]  ;;  %v3855_v45 = vpack.c.bf16 %v1548_v39, %v1544_v38  ;;  %v3858_v46 = vpack.c.bf16 %v1562_v36, %v1558_v35  ;;  %v1566_v47 = vld [vmem:[#allocation2 + $0x148] sm:$0xff] }
  0x2f   :  { %v1561_v44 = vld [vmem:[#allocation2 + $0x120] sm:$0xff]  ;;  %3096 = vmatpush1.bf16.msra.mxu1 %v3849_v37  ;;  %v3861_v48 = vpack.c.bf16 %v1547_v41, %v1543_v40  ;;  %v1552_v49 = vld [vmem:[#allocation2 + $0xd8] sm:$0xff]  ;;  %v1570_v51 = vld [vmem:[#allocation2 + $0x168] sm:$0xff] }
  0x30   :  { %v1556_v50 = vld [vmem:[#allocation2 + $0xf8] sm:$0xff]  ;;  %3098 = vmatprep.subr.bf16.mxu1 %v3855_v45  ;;  %v1551_v53 = vld [vmem:[#allocation2 + $0xd0] sm:$0xff]  ;;  %v3867_v55 = vpack.c.bf16 %v1561_v44, %v1557_v43  ;;  %v3870_v58 = vpack.c.bf16 %v1570_v51, %v1566_v47  ;;  %v1565_v59 = vld [vmem:[#allocation2 + $0x140] sm:$0xff] }
  0x31   :  { %3068 = vmatpush1.bf16.msra.mxu0 %v3840_v26  ;;  %v3864_v52 = vpack.c.bf16 %v1556_v50, %v1552_v49  ;;  %v1555_v54 = vld [vmem:[#allocation2 + $0xf0] sm:$0xff]  ;;  %v1560_v56 = vld [vmem:[#allocation2 + $0x118] sm:$0xff]  ;;  %v1569_v60 = vld [vmem:[#allocation2 + $0x160] sm:$0xff] }
  0x32   :  { %3070 = vmatprep.subr.bf16.mxu0 %v3844_v30  ;;  %v1564_v57 = vld [vmem:[#allocation2 + $0x138] sm:$0xff]  ;;  %v1574_v61 = vld [vmem:[#allocation2 + $0x188] sm:$0xff]  ;;  %v3873_v62 = vpack.c.bf16 %v1555_v54, %v1551_v53  ;;  %v1559_v2 = vld [vmem:[#allocation2 + $0x110] sm:$0xff]  ;;  %v3879_v7 = vpack.c.bf16 %v1569_v60, %v1565_v59 }
  0x33   :  { %3100 = vmatpush1.bf16.msra.mxu1 %v3861_v48  ;;  %v1578_v63 = vld [vmem:[#allocation2 + $0x1a8] sm:$0xff]  ;;  %v3876_v1 = vpack.c.bf16 %v1564_v57, %v1560_v56  ;;  %v1563_v3 = vld [vmem:[#allocation2 + $0x130] sm:$0xff]  ;;  %v1568_v5 = vld [vmem:[#allocation2 + $0x158] sm:$0xff] }
  0x34   :  { %3102 = vmatprep.subr.bf16.mxu1 %v3864_v52  ;;  %v1572_v6 = vld [vmem:[#allocation2 + $0x178] sm:$0xff]  ;;  %v3882_v10 = vpack.c.bf16 %v1578_v63, %v1574_v61  ;;  %v1573_v11 = vld [vmem:[#allocation2 + $0x180] sm:$0xff]  ;;  %v1582_v13 = vld [vmem:[#allocation2 + $0x1c8] sm:$0xff]  ;;  %v3885_v15 = vpack.c.bf16 %v1563_v3, %v1559_v2 }
  0x35   :  { %3072 = vmatpush1.bf16.msra.mxu0 %v3853_v42  ;;  %v1577_v12 = vld [vmem:[#allocation2 + $0x1a0] sm:$0xff]  ;;  %v1586_v16 = vld [vmem:[#allocation2 + $0x1e8] sm:$0xff]  ;;  %v3888_v18 = vpack.c.bf16 %v1572_v6, %v1568_v5  ;;  %v1567_v19 = vld [vmem:[#allocation2 + $0x150] sm:$0xff] }
  0x36   :  { %3074 = vmatprep.subr.bf16.mxu0 %v3858_v46  ;;  %v1571_v20 = vld [vmem:[#allocation2 + $0x170] sm:$0xff]  ;;  %v1576_v21 = vld [vmem:[#allocation2 + $0x198] sm:$0xff]  ;;  %v3891_v24 = vpack.c.bf16 %v1577_v12, %v1573_v11  ;;  %v3894_v27 = vpack.c.bf16 %v1586_v16, %v1582_v13  ;;  %v1581_v28 = vld [vmem:[#allocation2 + $0x1c0] sm:$0xff] }
  0x37   :  { %3104 = vmatpush1.bf16.msra.mxu1 %v3873_v62  ;;  %v1580_v23 = vld [vmem:[#allocation2 + $0x1b8] sm:$0xff]  ;;  %v1585_v29 = vld [vmem:[#allocation2 + $0x1e0] sm:$0xff]  ;;  %v3897_v31 = vpack.c.bf16 %v1571_v20, %v1567_v19  ;;  %v1575_v34 = vld [vmem:[#allocation2 + $0x190] sm:$0xff] }
  0x38   :  { %3106 = vmatprep.subr.bf16.mxu1 %v3876_v1  ;;  %v3900_v32 = vpack.c.bf16 %v1580_v23, %v1576_v21  ;;  %v1579_v35 = vld [vmem:[#allocation2 + $0x1b0] sm:$0xff]  ;;  %v1584_v36 = vld [vmem:[#allocation2 + $0x1d8] sm:$0xff]  ;;  %v3903_v39 = vpack.c.bf16 %v1585_v29, %v1581_v28  ;;  %v1521_v49 = vld [vmem:[#allocation6] sm:$0xff] }
  0x39   :  { %3076 = vmatpush1.bf16.msra.mxu0 %v3867_v55  ;;  %v1588_v38 = vld [vmem:[#allocation2 + $0x1f8] sm:$0xff]  ;;  %v3907_v40 = vpack.c.bf16 %v1579_v35, %v1575_v34  ;;  %v1583_v43 = vld [vmem:[#allocation2 + $0x1d0] sm:$0xff]  ;;  %v1522_v50 = vld [vmem:[#allocation6 + $0x8] sm:$0xff] }
  0x3a   :  { %3078 = vmatprep.subr.bf16.mxu0 %v3870_v58  ;;  %v3910_v41 = vpack.c.bf16 %v1588_v38, %v1584_v36  ;;  %v1587_v44 = vld [vmem:[#allocation2 + $0x1f0] sm:$0xff]  ;;  %v1524_v60 = vld [vmem:[#allocation6 + $0x18] sm:$0xff] }
  0x3b   :  { %3108 = vmatpush1.bf16.msra.mxu1 %v3885_v15  ;;  %v3914_v47 = vpack.c.bf16 %v1587_v44, %v1583_v43  ;;  %v1523_v3 = vld [vmem:[#allocation6 + $0x10] sm:$0xff]  ;;  %v1760_v44 = vld [vmem:[#allocation6 + $0x20] sm:$0xff] }
  0x3c   :  { %3110 = vmatprep.subr.bf16.mxu1 %v3888_v18 }
  0x3d   :  { %3080 = vmatpush1.bf16.msra.mxu0 %v3879_v7 }
  0x3e   :  { %3082 = vmatprep.subr.bf16.mxu0 %v3882_v10 }
  0x3f   :  { %3112 = vmatpush1.bf16.msra.mxu1 %v3897_v31 }
  0x40   :  { %3114 = vmatprep.subr.bf16.mxu1 %v3900_v32 }
  0x41   :  { %3084 = vmatpush1.bf16.msra.mxu0 %v3891_v24 }
  0x42   :  { %3086 = vmatprep.subr.bf16.mxu0 %v3894_v27 }
  0x43   :  { %3116 = vmatpush1.bf16.msra.mxu1 %v3907_v40 }
  0x44   :  { %3118 = vmatprep.subr.bf16.mxu1 %v3910_v41 }
  0x45   :  { %3088 = vmatpush1.bf16.msra.mxu0 %v3903_v39 }
  0x46   :  { %3122 = vmatprep.subr.bf16.mxu0 %v3822_v4 }
  0x47   :  { %3120 = vmatpush1.bf16.msra.mxu1 %v3914_v47 }
  0x48   :  { %1654 = vmatmul.mubr.f32.vlgmr.msra.gmra.mrb[0].mxu0 %v3779_v0  ;;  %3154 = vmatprep.subr.bf16.mxu1 %v3835_v22 }
  0x49   :  { %3124 = vmatpush1.bf16.msra.mxu0 %v3824_v8  ;;  %1828 = vmatprep.mubr.f32.mxu0 %v3779_v0 }
  0x4a   :  { %3126 = vmatprep.subr.bf16.mxu0 %v3826_v9  ;;  %1725 = vmatmul.mubr.f32.vlgmr.msra.gmra.mrb[0].mxu1 %v3779_v0 }
  0x4b   :  { %3156 = vmatpush1.bf16.msra.mxu1 %v3837_v25  ;;  %1899 = vmatprep.mubr.f32.mxu1 %v3779_v0 }
  0x4c   :  { %3158 = vmatprep.subr.bf16.mxu1 %v3847_v33 }
  0x4d   :  { %3128 = vmatpush1.bf16.msra.mxu0 %v3830_v14 }
  0x4e   :  { %3130 = vmatprep.subr.bf16.mxu0 %v3833_v17 }
  0x4f   :  { %3160 = vmatpush1.bf16.msra.mxu1 %v3849_v37 }
  0x50   :  { %3162 = vmatprep.subr.bf16.mxu1 %v3855_v45 }
  0x51   :  { %3132 = vmatpush1.bf16.msra.mxu0 %v3840_v26 }
  0x52   :  { %3134 = vmatprep.subr.bf16.mxu0 %v3844_v30 }
  0x53   :  { %3164 = vmatpush1.bf16.msra.mxu1 %v3861_v48 }
  0x54   :  { %3166 = vmatprep.subr.bf16.mxu1 %v3864_v52 }
  0x55   :  { %3136 = vmatpush1.bf16.msra.mxu0 %v3853_v42 }
  0x56   :  { %3138 = vmatprep.subr.bf16.mxu0 %v3858_v46 }
  0x57   :  { %3168 = vmatpush1.bf16.msra.mxu1 %v3873_v62 }
  0x58   :  { %3170 = vmatprep.subr.bf16.mxu1 %v3876_v1 }
  0x59   :  { %3140 = vmatpush1.bf16.msra.mxu0 %v3867_v55 }
  0x5a   :  { %3142 = vmatprep.subr.bf16.mxu0 %v3870_v58 }
  0x5b   :  { %3172 = vmatpush1.bf16.msra.mxu1 %v3885_v15 }
  0x5c   :  { %3174 = vmatprep.subr.bf16.mxu1 %v3888_v18 }
  0x5d   :  { %3144 = vmatpush1.bf16.msra.mxu0 %v3879_v7 }
  0x5e   :  { %3146 = vmatprep.subr.bf16.mxu0 %v3882_v10 }
  0x5f   :  { %3176 = vmatpush1.bf16.msra.mxu1 %v3897_v31 }
  0x60   :  { %3178 = vmatprep.subr.bf16.mxu1 %v3900_v32 }
  0x61   :  { %3148 = vmatpush1.bf16.msra.mxu0 %v3891_v24 }
  0x62   :  { %3150 = vmatprep.subr.bf16.mxu0 %v3894_v27 }
  0x63   :  { %3180 = vmatpush1.bf16.msra.mxu1 %v3907_v40 }
  0x64   :  { %3182 = vmatprep.subr.bf16.mxu1 %v3910_v41 }
  0x65   :  { %3152 = vmatpush1.bf16.msra.mxu0 %v3903_v39 }
  0x66   :  { %3186 = vmatprep.subr.bf16.mxu0 %v3822_v4 }
  0x67   :  { %3184 = vmatpush1.bf16.msra.mxu1 %v3914_v47 }
  0x68   :  { %3218 = vmatprep.subr.bf16.mxu1 %v3835_v22 }
 0x11b   :  { %v1655_v51 = vpop.f32.mrb[0].mxu0 }
 0x11c   :  { %v1731_v53 = vadd.f32 %v1655_v51, %v1521_v49  ;;  %v1657_v54 = vpop.f32.mrb[1].mxu0  ;;  %v1761_v49 = vld [vmem:[#allocation6 + $0x28] sm:$0xff] }
 0x11d   :  { %v1732_v56 = vadd.f32 %v1657_v54, %v1522_v50  ;;  %v1726_v61 = vpop.f32.mrb[0].mxu1 }
 0x11e   :  { %v3032_v57 = vmul.f32 -1.442695, %v1731_v53  ;;  %v1728_v63 = vpop.f32.mrb[1].mxu1  ;;  %v1733_v6 = vadd.f32 %v1726_v61, %v1523_v3  ;;  %v1763_v61 = vld [vmem:[#allocation6 + $0x38] sm:$0xff] }
 0x11f   :  { %v3033_v59 = vmul.f32 -1.442695, %v1732_v56  ;;  %v1734_v2 = vadd.f32 %v1728_v63, %v1524_v60 }
 0x120   :  { %3575 = vpow2.f32 %v3032_v57 }
 0x121   :  { %3577 = vpow2.f32 %v3033_v59  ;;  %v3034_v5 = vmul.f32 -1.442695, %v1734_v2  ;;  %v1762_v2 = vld [vmem:[#allocation6 + $0x30] sm:$0xff] }
 0x123   :  { %3579 = vpow2.f32 %v3034_v5 }
 0x124   :  { %3581 = vtanh.f32 %v1733_v6 }
 0x12a   :  { %v3576_v11 = vpop.eup %3575 }
 0x12b   :  { %v3578_v12 = vpop.eup %3577  ;;  %v1738_v13 = vadd.f32 1.0, %v3576_v11 }
 0x12c   :  { %v1744_v16 = vadd.f32 1.0, %v3578_v12 }
 0x12d   :  { %3583 = vrcp.f32 %v1738_v13  ;;  %v3580_v19 = vpop.eup %3579 }
 0x12e   :  { %3585 = vrcp.f32 %v1744_v16  ;;  %v3582_v20 = vpop.eup %3581  ;;  %v1751_v23 = vadd.f32 1.0, %v3580_v19 }
 0x130   :  { %3587 = vrcp.f32 %v1751_v23 }
 0x137   :  { %v3584_v21 = vpop.eup %3583 }
 0x138   :  { %v3586_v28 = vpop.eup %3585  ;;  %v1755_v29 = vmul.f32 %v3584_v21, %v3582_v20 }
 0x139   :  { %v1754_v34 = vmul.f32 0.0, %v3586_v28 }
 0x13a   :  { %v3588_v36 = vpop.eup %3587 }
 0x13b   :  { %v3956_v35 = vadd.f32 %v1755_v29, %v1754_v34 }
 0x13d   :  { %3589 = vtanh.f32 %v3956_v35 }
 0x147   :  { %v3590_v38 = vpop.eup %3589 }
 0x148   :  { %v1758_v43 = vmul.f32 %v3590_v38, %v3588_v36 }
 0x14a   :  { %1829 = vmatmul.mubr.f32.vlgmr.msra.gmra.mrb[2].mxu0 %v1758_v43  ;;  %1900 = vmatmul.mubr.f32.vlgmr.msra.gmra.mrb[2].mxu1 %v1758_v43 }
 0x14b   :  { %3188 = vmatpush1.bf16.msra.mxu0 %v3824_v8  ;;  %3220 = vmatpush1.bf16.msra.mxu1 %v3837_v25 }
 0x14c   :  { %3190 = vmatprep.subr.bf16.mxu0 %v3826_v9  ;;  %3222 = vmatprep.subr.bf16.mxu1 %v3847_v33 }
 0x14d   :  { %2003 = vmatprep.mubr.f32.mxu0 %v3779_v0  ;;  %2074 = vmatprep.mubr.f32.mxu1 %v3779_v0 }
 0x14f   :  { %3192 = vmatpush1.bf16.msra.mxu0 %v3830_v14  ;;  %3224 = vmatpush1.bf16.msra.mxu1 %v3849_v37 }
 0x150   :  { %3194 = vmatprep.subr.bf16.mxu0 %v3833_v17  ;;  %3226 = vmatprep.subr.bf16.mxu1 %v3855_v45 }
 0x153   :  { %3196 = vmatpush1.bf16.msra.mxu0 %v3840_v26  ;;  %3228 = vmatpush1.bf16.msra.mxu1 %v3861_v48 }
 0x154   :  { %3198 = vmatprep.subr.bf16.mxu0 %v3844_v30  ;;  %3230 = vmatprep.subr.bf16.mxu1 %v3864_v52 }
 0x157   :  { %3200 = vmatpush1.bf16.msra.mxu0 %v3853_v42  ;;  %3232 = vmatpush1.bf16.msra.mxu1 %v3873_v62 }
 0x158   :  { %3202 = vmatprep.subr.bf16.mxu0 %v3858_v46  ;;  %3234 = vmatprep.subr.bf16.mxu1 %v3876_v1 }
 0x15b   :  { %3204 = vmatpush1.bf16.msra.mxu0 %v3867_v55  ;;  %3236 = vmatpush1.bf16.msra.mxu1 %v3885_v15 }
 0x15c   :  { %3206 = vmatprep.subr.bf16.mxu0 %v3870_v58  ;;  %3238 = vmatprep.subr.bf16.mxu1 %v3888_v18 }
 0x15f   :  { %3208 = vmatpush1.bf16.msra.mxu0 %v3879_v7  ;;  %3240 = vmatpush1.bf16.msra.mxu1 %v3897_v31 }
 0x160   :  { %3210 = vmatprep.subr.bf16.mxu0 %v3882_v10  ;;  %3242 = vmatprep.subr.bf16.mxu1 %v3900_v32 }
 0x163   :  { %3212 = vmatpush1.bf16.msra.mxu0 %v3891_v24  ;;  %3244 = vmatpush1.bf16.msra.mxu1 %v3907_v40 }
 0x164   :  { %3214 = vmatprep.subr.bf16.mxu0 %v3894_v27  ;;  %3246 = vmatprep.subr.bf16.mxu1 %v3910_v41 }
 0x167   :  { %3216 = vmatpush1.bf16.msra.mxu0 %v3903_v39  ;;  %3248 = vmatpush1.bf16.msra.mxu1 %v3914_v47 }
 0x168   :  { %3250 = vmatprep.subr.bf16.mxu0 %v3822_v4  ;;  %3282 = vmatprep.subr.bf16.mxu1 %v3835_v22 }
 0x21d   :  { %v1830_v50 = vpop.f32.mrb[2].mxu0  ;;  %v1901_v51 = vpop.f32.mrb[2].mxu1 }
 0x21e   :  { %v1906_v53 = vadd.f32 %v1830_v50, %v1760_v44  ;;  %v1832_v54 = vpop.f32.mrb[3].mxu0  ;;  %v1903_v56 = vpop.f32.mrb[3].mxu1  ;;  %v1908_v5 = vadd.f32 %v1901_v51, %v1762_v2  ;;  %v1936_v44 = vld [vmem:[#allocation6 + $0x48] sm:$0xff] }
 0x21f   :  { %v1907_v57 = vadd.f32 %v1832_v54, %v1761_v49  ;;  %v1909_v63 = vadd.f32 %v1903_v56, %v1763_v61 }
 0x220   :  { %v3035_v59 = vmul.f32 -1.442695, %v1906_v53 }
 0x221   :  { %v3036_v60 = vmul.f32 -1.442695, %v1907_v57  ;;  %v3037_v3 = vmul.f32 -1.442695, %v1909_v63  ;;  %v1937_v63 = vld [vmem:[#allocation6 + $0x50] sm:$0xff] }
 0x222   :  { %3591 = vpow2.f32 %v3035_v59 }
 0x223   :  { %3593 = vpow2.f32 %v3036_v60  ;;  %v1938_v60 = vld [vmem:[#allocation6 + $0x58] sm:$0xff] }
 0x224   :  { %3595 = vpow2.f32 %v3037_v3 }
 0x225   :  { %3597 = vtanh.f32 %v1908_v5 }
 0x22c   :  { %v3592_v6 = vpop.eup %3591 }
 0x22d   :  { %v3594_v11 = vpop.eup %3593  ;;  %v1913_v12 = vadd.f32 1.0, %v3592_v6 }
 0x22e   :  { %v1919_v13 = vadd.f32 1.0, %v3594_v11  ;;  %v3596_v16 = vpop.eup %3595 }
 0x22f   :  { %3599 = vrcp.f32 %v1913_v12  ;;  %v3598_v19 = vpop.eup %3597  ;;  %v1926_v28 = vadd.f32 1.0, %v3596_v16 }
 0x230   :  { %3601 = vrcp.f32 %v1919_v13 }
 0x231   :  { %3603 = vrcp.f32 %v1926_v28 }
 0x239   :  { %v3600_v20 = vpop.eup %3599 }
 0x23a   :  { %v3602_v21 = vpop.eup %3601  ;;  %v1930_v23 = vmul.f32 %v3600_v20, %v3598_v19 }
 0x23b   :  { %v1929_v29 = vmul.f32 %v3602_v21, %v3956_v35  ;;  %v3604_v36 = vpop.eup %3603  ;;  %v1935_v35 = vld [vmem:[#allocation6 + $0x40] sm:$0xff] }
 0x23d   :  { %v3994_v34 = vadd.f32 %v1930_v23, %v1929_v29 }
 0x23f   :  { %3605 = vtanh.f32 %v3994_v34 }
 0x249   :  { %v3606_v38 = vpop.eup %3605 }
 0x24a   :  { %v1933_v43 = vmul.f32 %v3606_v38, %v3604_v36 }
 0x24c   :  { %2004 = vmatmul.mubr.f32.vlgmr.msra.gmra.mrb[4].mxu0 %v1933_v43  ;;  %2075 = vmatmul.mubr.f32.vlgmr.msra.gmra.mrb[4].mxu1 %v1933_v43 }
 0x24d   :  { %3252 = vmatpush1.bf16.msra.mxu0 %v3824_v8  ;;  %3284 = vmatpush1.bf16.msra.mxu1 %v3837_v25 }
 0x24e   :  { %3254 = vmatprep.subr.bf16.mxu0 %v3826_v9  ;;  %3286 = vmatprep.subr.bf16.mxu1 %v3847_v33 }
 0x24f   :  { %2178 = vmatprep.mubr.f32.mxu0 %v3779_v0  ;;  %2249 = vmatprep.mubr.f32.mxu1 %v3779_v0 }
 0x251   :  { %3256 = vmatpush1.bf16.msra.mxu0 %v3830_v14  ;;  %3288 = vmatpush1.bf16.msra.mxu1 %v3849_v37 }
 0x252   :  { %3258 = vmatprep.subr.bf16.mxu0 %v3833_v17  ;;  %3290 = vmatprep.subr.bf16.mxu1 %v3855_v45 }
 0x255   :  { %3260 = vmatpush1.bf16.msra.mxu0 %v3840_v26  ;;  %3292 = vmatpush1.bf16.msra.mxu1 %v3861_v48 }
 0x256   :  { %3262 = vmatprep.subr.bf16.mxu0 %v3844_v30  ;;  %3294 = vmatprep.subr.bf16.mxu1 %v3864_v52 }
 0x259   :  { %3264 = vmatpush1.bf16.msra.mxu0 %v3853_v42  ;;  %3296 = vmatpush1.bf16.msra.mxu1 %v3873_v62 }
 0x25a   :  { %3266 = vmatprep.subr.bf16.mxu0 %v3858_v46  ;;  %3298 = vmatprep.subr.bf16.mxu1 %v3876_v1 }
 0x25d   :  { %3268 = vmatpush1.bf16.msra.mxu0 %v3867_v55  ;;  %3300 = vmatpush1.bf16.msra.mxu1 %v3885_v15 }
 0x25e   :  { %3270 = vmatprep.subr.bf16.mxu0 %v3870_v58  ;;  %3302 = vmatprep.subr.bf16.mxu1 %v3888_v18 }
 0x261   :  { %3272 = vmatpush1.bf16.msra.mxu0 %v3879_v7  ;;  %3304 = vmatpush1.bf16.msra.mxu1 %v3897_v31 }
 0x262   :  { %3274 = vmatprep.subr.bf16.mxu0 %v3882_v10  ;;  %3306 = vmatprep.subr.bf16.mxu1 %v3900_v32 }
 0x265   :  { %3276 = vmatpush1.bf16.msra.mxu0 %v3891_v24  ;;  %3308 = vmatpush1.bf16.msra.mxu1 %v3907_v40 }
 0x266   :  { %3278 = vmatprep.subr.bf16.mxu0 %v3894_v27  ;;  %3310 = vmatprep.subr.bf16.mxu1 %v3910_v41 }
 0x269   :  { %3280 = vmatpush1.bf16.msra.mxu0 %v3903_v39  ;;  %3312 = vmatpush1.bf16.msra.mxu1 %v3914_v47 }
 0x26a   :  { %3314 = vmatprep.subr.bf16.mxu0 %v3822_v4  ;;  %3346 = vmatprep.subr.bf16.mxu1 %v3835_v22 }
 0x31f   :  { %v2005_v49 = vpop.f32.mrb[4].mxu0  ;;  %v2076_v50 = vpop.f32.mrb[4].mxu1 }
 0x320   :  { %v2081_v51 = vadd.f32 %v2005_v49, %v1935_v35  ;;  %v2007_v53 = vpop.f32.mrb[5].mxu0  ;;  %v2078_v54 = vpop.f32.mrb[5].mxu1  ;;  %v2083_v3 = vadd.f32 %v2076_v50, %v1937_v63  ;;  %v2111_v35 = vld [vmem:[#allocation6 + $0x68] sm:$0xff] }
 0x321   :  { %v2082_v56 = vadd.f32 %v2007_v53, %v1936_v44  ;;  %v2084_v61 = vadd.f32 %v2078_v54, %v1938_v60 }
 0x322   :  { %v3038_v57 = vmul.f32 -1.442695, %v2081_v51 }
 0x323   :  { %v3039_v59 = vmul.f32 -1.442695, %v2082_v56  ;;  %v3040_v2 = vmul.f32 -1.442695, %v2084_v61  ;;  %v2112_v61 = vld [vmem:[#allocation6 + $0x70] sm:$0xff] }
 0x324   :  { %3607 = vpow2.f32 %v3038_v57 }
 0x325   :  { %3609 = vpow2.f32 %v3039_v59  ;;  %v2113_v59 = vld [vmem:[#allocation6 + $0x78] sm:$0xff] }
 0x326   :  { %3611 = vpow2.f32 %v3040_v2 }
 0x327   :  { %3613 = vtanh.f32 %v2083_v3 }
 0x32e   :  { %v3608_v5 = vpop.eup %3607 }
 0x32f   :  { %v3610_v6 = vpop.eup %3609  ;;  %v2088_v11 = vadd.f32 1.0, %v3608_v5 }
 0x330   :  { %v2094_v12 = vadd.f32 1.0, %v3610_v6  ;;  %v3612_v13 = vpop.eup %3611 }
 0x331   :  { %3615 = vrcp.f32 %v2088_v11  ;;  %v3614_v16 = vpop.eup %3613  ;;  %v2101_v23 = vadd.f32 1.0, %v3612_v13 }
 0x332   :  { %3617 = vrcp.f32 %v2094_v12 }
 0x333   :  { %3619 = vrcp.f32 %v2101_v23 }
 0x33b   :  { %v3616_v19 = vpop.eup %3615 }
 0x33c   :  { %v3618_v20 = vpop.eup %3617  ;;  %v2105_v21 = vmul.f32 %v3616_v19, %v3614_v16 }
 0x33d   :  { %v2104_v28 = vmul.f32 %v3618_v20, %v3994_v34  ;;  %v3620_v36 = vpop.eup %3619  ;;  %v2110_v34 = vld [vmem:[#allocation6 + $0x60] sm:$0xff] }
 0x33f   :  { %v4032_v29 = vadd.f32 %v2105_v21, %v2104_v28 }
 0x341   :  { %3621 = vtanh.f32 %v4032_v29 }
 0x34b   :  { %v3622_v38 = vpop.eup %3621 }
 0x34c   :  { %v2108_v43 = vmul.f32 %v3622_v38, %v3620_v36 }
 0x34e   :  { %2179 = vmatmul.mubr.f32.vlgmr.msra.gmra.mrb[6].mxu0 %v2108_v43  ;;  %2250 = vmatmul.mubr.f32.vlgmr.msra.gmra.mrb[6].mxu1 %v2108_v43 }
 0x34f   :  { %3316 = vmatpush1.bf16.msra.mxu0 %v3824_v8  ;;  %3348 = vmatpush1.bf16.msra.mxu1 %v3837_v25 }
 0x350   :  { %3318 = vmatprep.subr.bf16.mxu0 %v3826_v9  ;;  %3350 = vmatprep.subr.bf16.mxu1 %v3847_v33 }
 0x351   :  { %2353 = vmatprep.mubr.f32.mxu0 %v3779_v0  ;;  %2424 = vmatprep.mubr.f32.mxu1 %v3779_v0 }
 0x353   :  { %3320 = vmatpush1.bf16.msra.mxu0 %v3830_v14  ;;  %3352 = vmatpush1.bf16.msra.mxu1 %v3849_v37 }
 0x354   :  { %3322 = vmatprep.subr.bf16.mxu0 %v3833_v17  ;;  %3354 = vmatprep.subr.bf16.mxu1 %v3855_v45 }
 0x357   :  { %3324 = vmatpush1.bf16.msra.mxu0 %v3840_v26  ;;  %3356 = vmatpush1.bf16.msra.mxu1 %v3861_v48 }
 0x358   :  { %3326 = vmatprep.subr.bf16.mxu0 %v3844_v30  ;;  %3358 = vmatprep.subr.bf16.mxu1 %v3864_v52 }
 0x35b   :  { %3328 = vmatpush1.bf16.msra.mxu0 %v3853_v42  ;;  %3360 = vmatpush1.bf16.msra.mxu1 %v3873_v62 }
 0x35c   :  { %3330 = vmatprep.subr.bf16.mxu0 %v3858_v46  ;;  %3362 = vmatprep.subr.bf16.mxu1 %v3876_v1 }
 0x35f   :  { %3332 = vmatpush1.bf16.msra.mxu0 %v3867_v55  ;;  %3364 = vmatpush1.bf16.msra.mxu1 %v3885_v15 }
 0x360   :  { %3334 = vmatprep.subr.bf16.mxu0 %v3870_v58  ;;  %3366 = vmatprep.subr.bf16.mxu1 %v3888_v18 }
 0x363   :  { %3336 = vmatpush1.bf16.msra.mxu0 %v3879_v7  ;;  %3368 = vmatpush1.bf16.msra.mxu1 %v3897_v31 }
 0x364   :  { %3338 = vmatprep.subr.bf16.mxu0 %v3882_v10  ;;  %3370 = vmatprep.subr.bf16.mxu1 %v3900_v32 }
 0x367   :  { %3340 = vmatpush1.bf16.msra.mxu0 %v3891_v24  ;;  %3372 = vmatpush1.bf16.msra.mxu1 %v3907_v40 }
 0x368   :  { %3342 = vmatprep.subr.bf16.mxu0 %v3894_v27  ;;  %3374 = vmatprep.subr.bf16.mxu1 %v3910_v41 }
 0x36b   :  { %3344 = vmatpush1.bf16.msra.mxu0 %v3903_v39  ;;  %3376 = vmatpush1.bf16.msra.mxu1 %v3914_v47 }
 0x36c   :  { %3378 = vmatprep.subr.bf16.mxu0 %v3822_v4  ;;  %3410 = vmatprep.subr.bf16.mxu1 %v3835_v22 }
 0x421   :  { %v2180_v44 = vpop.f32.mrb[6].mxu0  ;;  %v2251_v49 = vpop.f32.mrb[6].mxu1 }
 0x422   :  { %v2256_v50 = vadd.f32 %v2180_v44, %v2110_v34  ;;  %v2182_v51 = vpop.f32.mrb[7].mxu0  ;;  %v2253_v53 = vpop.f32.mrb[7].mxu1  ;;  %v2258_v2 = vadd.f32 %v2251_v49, %v2112_v61  ;;  %v2286_v34 = vld [vmem:[#allocation6 + $0x88] sm:$0xff] }
 0x423   :  { %v2257_v54 = vadd.f32 %v2182_v51, %v2111_v35  ;;  %v2259_v60 = vadd.f32 %v2253_v53, %v2113_v59 }
 0x424   :  { %v3041_v56 = vmul.f32 -1.442695, %v2256_v50 }
 0x425   :  { %v3042_v57 = vmul.f32 -1.442695, %v2257_v54  ;;  %v3043_v63 = vmul.f32 -1.442695, %v2259_v60  ;;  %v2287_v60 = vld [vmem:[#allocation6 + $0x90] sm:$0xff] }
 0x426   :  { %3623 = vpow2.f32 %v3041_v56 }
 0x427   :  { %3625 = vpow2.f32 %v3042_v57  ;;  %v2288_v57 = vld [vmem:[#allocation6 + $0x98] sm:$0xff] }
 0x428   :  { %3627 = vpow2.f32 %v3043_v63 }
 0x429   :  { %3629 = vtanh.f32 %v2258_v2 }
 0x430   :  { %v3624_v3 = vpop.eup %3623 }
 0x431   :  { %v3626_v5 = vpop.eup %3625  ;;  %v2263_v6 = vadd.f32 1.0, %v3624_v3 }
 0x432   :  { %v2269_v11 = vadd.f32 1.0, %v3626_v5  ;;  %v3628_v12 = vpop.eup %3627 }
 0x433   :  { %3631 = vrcp.f32 %v2263_v6  ;;  %v3630_v13 = vpop.eup %3629  ;;  %v2276_v21 = vadd.f32 1.0, %v3628_v12 }
 0x434   :  { %3633 = vrcp.f32 %v2269_v11 }
 0x435   :  { %3635 = vrcp.f32 %v2276_v21 }
 0x43d   :  { %v3632_v16 = vpop.eup %3631 }
 0x43e   :  { %v3634_v19 = vpop.eup %3633  ;;  %v2280_v20 = vmul.f32 %v3632_v16, %v3630_v13 }
 0x43f   :  { %v2279_v23 = vmul.f32 %v3634_v19, %v4032_v29  ;;  %v3636_v36 = vpop.eup %3635  ;;  %v2285_v29 = vld [vmem:[#allocation6 + $0x80] sm:$0xff] }
 0x441   :  { %v4070_v28 = vadd.f32 %v2280_v20, %v2279_v23 }
 0x443   :  { %3637 = vtanh.f32 %v4070_v28 }
 0x44d   :  { %v3638_v38 = vpop.eup %3637 }
 0x44e   :  { %v2283_v43 = vmul.f32 %v3638_v38, %v3636_v36 }
 0x450   :  { %2354 = vmatmul.mubr.f32.vlgmr.msra.gmra.mrb[8].mxu0 %v2283_v43  ;;  %2425 = vmatmul.mubr.f32.vlgmr.msra.gmra.mrb[8].mxu1 %v2283_v43 }
 0x451   :  { %3380 = vmatpush1.bf16.msra.mxu0 %v3824_v8  ;;  %3412 = vmatpush1.bf16.msra.mxu1 %v3837_v25 }
 0x452   :  { %3382 = vmatprep.subr.bf16.mxu0 %v3826_v9  ;;  %3414 = vmatprep.subr.bf16.mxu1 %v3847_v33 }
 0x453   :  { %2528 = vmatprep.mubr.f32.mxu0 %v3779_v0  ;;  %2599 = vmatprep.mubr.f32.mxu1 %v3779_v0 }
 0x455   :  { %3384 = vmatpush1.bf16.msra.mxu0 %v3830_v14  ;;  %3416 = vmatpush1.bf16.msra.mxu1 %v3849_v37 }
 0x456   :  { %3386 = vmatprep.subr.bf16.mxu0 %v3833_v17  ;;  %3418 = vmatprep.subr.bf16.mxu1 %v3855_v45 }
 0x459   :  { %3388 = vmatpush1.bf16.msra.mxu0 %v3840_v26  ;;  %3420 = vmatpush1.bf16.msra.mxu1 %v3861_v48 }
 0x45a   :  { %3390 = vmatprep.subr.bf16.mxu0 %v3844_v30  ;;  %3422 = vmatprep.subr.bf16.mxu1 %v3864_v52 }
 0x45d   :  { %3392 = vmatpush1.bf16.msra.mxu0 %v3853_v42  ;;  %3424 = vmatpush1.bf16.msra.mxu1 %v3873_v62 }
 0x45e   :  { %3394 = vmatprep.subr.bf16.mxu0 %v3858_v46  ;;  %3426 = vmatprep.subr.bf16.mxu1 %v3876_v1 }
 0x461   :  { %3396 = vmatpush1.bf16.msra.mxu0 %v3867_v55  ;;  %3428 = vmatpush1.bf16.msra.mxu1 %v3885_v15 }
 0x462   :  { %3398 = vmatprep.subr.bf16.mxu0 %v3870_v58  ;;  %3430 = vmatprep.subr.bf16.mxu1 %v3888_v18 }
 0x465   :  { %3400 = vmatpush1.bf16.msra.mxu0 %v3879_v7  ;;  %3432 = vmatpush1.bf16.msra.mxu1 %v3897_v31 }
 0x466   :  { %3402 = vmatprep.subr.bf16.mxu0 %v3882_v10  ;;  %3434 = vmatprep.subr.bf16.mxu1 %v3900_v32 }
 0x469   :  { %3404 = vmatpush1.bf16.msra.mxu0 %v3891_v24  ;;  %3436 = vmatpush1.bf16.msra.mxu1 %v3907_v40 }
 0x46a   :  { %3406 = vmatprep.subr.bf16.mxu0 %v3894_v27  ;;  %3438 = vmatprep.subr.bf16.mxu1 %v3910_v41 }
 0x46d   :  { %3408 = vmatpush1.bf16.msra.mxu0 %v3903_v39  ;;  %3440 = vmatpush1.bf16.msra.mxu1 %v3914_v47 }
 0x46e   :  { %3442 = vmatprep.subr.bf16.mxu0 %v3822_v4  ;;  %3474 = vmatprep.subr.bf16.mxu1 %v3835_v22 }
 0x523   :  { %v2355_v35 = vpop.f32.mrb[8].mxu0  ;;  %v2426_v44 = vpop.f32.mrb[8].mxu1 }
 0x524   :  { %v2431_v49 = vadd.f32 %v2355_v35, %v2285_v29  ;;  %v2357_v50 = vpop.f32.mrb[9].mxu0  ;;  %v2428_v51 = vpop.f32.mrb[9].mxu1  ;;  %v2433_v63 = vadd.f32 %v2426_v44, %v2287_v60  ;;  %v2461_v29 = vld [vmem:[#allocation6 + $0xa8] sm:$0xff] }
 0x525   :  { %v2432_v53 = vadd.f32 %v2357_v50, %v2286_v34  ;;  %v2434_v59 = vadd.f32 %v2428_v51, %v2288_v57 }
 0x526   :  { %v3044_v54 = vmul.f32 -1.442695, %v2431_v49 }
 0x527   :  { %v3045_v56 = vmul.f32 -1.442695, %v2432_v53  ;;  %v3046_v61 = vmul.f32 -1.442695, %v2434_v59  ;;  %v2462_v59 = vld [vmem:[#allocation6 + $0xb0] sm:$0xff] }
 0x528   :  { %3639 = vpow2.f32 %v3044_v54 }
 0x529   :  { %3641 = vpow2.f32 %v3045_v56  ;;  %v2463_v56 = vld [vmem:[#allocation6 + $0xb8] sm:$0xff] }
 0x52a   :  { %3643 = vpow2.f32 %v3046_v61 }
 0x52b   :  { %3645 = vtanh.f32 %v2433_v63 }
 0x532   :  { %v3640_v2 = vpop.eup %3639 }
 0x533   :  { %v3642_v3 = vpop.eup %3641  ;;  %v2438_v5 = vadd.f32 1.0, %v3640_v2 }
 0x534   :  { %v2444_v6 = vadd.f32 1.0, %v3642_v3  ;;  %v3644_v11 = vpop.eup %3643 }
 0x535   :  { %3647 = vrcp.f32 %v2438_v5  ;;  %v3646_v12 = vpop.eup %3645  ;;  %v2451_v20 = vadd.f32 1.0, %v3644_v11 }
 0x536   :  { %3649 = vrcp.f32 %v2444_v6 }
 0x537   :  { %3651 = vrcp.f32 %v2451_v20 }
 0x53f   :  { %v3648_v13 = vpop.eup %3647 }
 0x540   :  { %v3650_v16 = vpop.eup %3649  ;;  %v2455_v19 = vmul.f32 %v3648_v13, %v3646_v12 }
 0x541   :  { %v2454_v21 = vmul.f32 %v3650_v16, %v4070_v28  ;;  %v3652_v36 = vpop.eup %3651  ;;  %v2460_v28 = vld [vmem:[#allocation6 + $0xa0] sm:$0xff] }
 0x543   :  { %v4108_v23 = vadd.f32 %v2455_v19, %v2454_v21 }
 0x545   :  { %3653 = vtanh.f32 %v4108_v23 }
 0x54f   :  { %v3654_v38 = vpop.eup %3653 }
 0x550   :  { %v2458_v43 = vmul.f32 %v3654_v38, %v3652_v36 }
 0x552   :  { %2529 = vmatmul.mubr.f32.vlgmr.msra.gmra.mrb[10].mxu0 %v2458_v43  ;;  %2600 = vmatmul.mubr.f32.vlgmr.msra.gmra.mrb[10].mxu1 %v2458_v43 }
 0x553   :  { %3444 = vmatpush1.bf16.msra.mxu0 %v3824_v8  ;;  %3476 = vmatpush1.bf16.msra.mxu1 %v3837_v25 }
 0x554   :  { %3446 = vmatprep.subr.bf16.mxu0 %v3826_v9  ;;  %3478 = vmatprep.subr.bf16.mxu1 %v3847_v33 }
 0x555   :  { %2703 = vmatprep.mubr.f32.mxu0 %v3779_v0  ;;  %2774 = vmatprep.mubr.f32.mxu1 %v3779_v0 }
 0x557   :  { %3448 = vmatpush1.bf16.msra.mxu0 %v3830_v14  ;;  %3480 = vmatpush1.bf16.msra.mxu1 %v3849_v37 }
 0x558   :  { %3450 = vmatprep.subr.bf16.mxu0 %v3833_v17  ;;  %3482 = vmatprep.subr.bf16.mxu1 %v3855_v45 }
 0x55b   :  { %3452 = vmatpush1.bf16.msra.mxu0 %v3840_v26  ;;  %3484 = vmatpush1.bf16.msra.mxu1 %v3861_v48 }
 0x55c   :  { %3454 = vmatprep.subr.bf16.mxu0 %v3844_v30  ;;  %3486 = vmatprep.subr.bf16.mxu1 %v3864_v52 }
 0x55f   :  { %3456 = vmatpush1.bf16.msra.mxu0 %v3853_v42  ;;  %3488 = vmatpush1.bf16.msra.mxu1 %v3873_v62 }
 0x560   :  { %3458 = vmatprep.subr.bf16.mxu0 %v3858_v46  ;;  %3490 = vmatprep.subr.bf16.mxu1 %v3876_v1 }
 0x563   :  { %3460 = vmatpush1.bf16.msra.mxu0 %v3867_v55  ;;  %3492 = vmatpush1.bf16.msra.mxu1 %v3885_v15 }
 0x564   :  { %3462 = vmatprep.subr.bf16.mxu0 %v3870_v58  ;;  %3494 = vmatprep.subr.bf16.mxu1 %v3888_v18 }
 0x567   :  { %3464 = vmatpush1.bf16.msra.mxu0 %v3879_v7  ;;  %3496 = vmatpush1.bf16.msra.mxu1 %v3897_v31 }
 0x568   :  { %3466 = vmatprep.subr.bf16.mxu0 %v3882_v10  ;;  %3498 = vmatprep.subr.bf16.mxu1 %v3900_v32 }
 0x56b   :  { %3468 = vmatpush1.bf16.msra.mxu0 %v3891_v24  ;;  %3500 = vmatpush1.bf16.msra.mxu1 %v3907_v40 }
 0x56c   :  { %3470 = vmatprep.subr.bf16.mxu0 %v3894_v27  ;;  %3502 = vmatprep.subr.bf16.mxu1 %v3910_v41 }
 0x56f   :  { %3472 = vmatpush1.bf16.msra.mxu0 %v3903_v39  ;;  %3504 = vmatpush1.bf16.msra.mxu1 %v3914_v47 }
 0x570   :  { %3506 = vmatprep.subr.bf16.mxu0 %v3822_v4  ;;  %3538 = vmatprep.subr.bf16.mxu1 %v3835_v22 }
 0x625   :  { %v2530_v34 = vpop.f32.mrb[10].mxu0  ;;  %v2601_v35 = vpop.f32.mrb[10].mxu1 }
 0x626   :  { %v2606_v44 = vadd.f32 %v2530_v34, %v2460_v28  ;;  %v2532_v49 = vpop.f32.mrb[11].mxu0  ;;  %v2603_v50 = vpop.f32.mrb[11].mxu1  ;;  %v2608_v61 = vadd.f32 %v2601_v35, %v2462_v59 }
 0x627   :  { %v2607_v51 = vadd.f32 %v2532_v49, %v2461_v29  ;;  %v2609_v57 = vadd.f32 %v2603_v50, %v2463_v56  ;;  %v2813_v50 = vld [vmem:[#allocation6 + $0xf8] sm:$0xff] }
 0x628   :  { %v3047_v53 = vmul.f32 -1.442695, %v2606_v44 }
 0x629   :  { %v3048_v54 = vmul.f32 -1.442695, %v2607_v51  ;;  %v3049_v60 = vmul.f32 -1.442695, %v2609_v57 }
 0x62a   :  { %3655 = vpow2.f32 %v3047_v53  ;;  %v2812_v53 = vld [vmem:[#allocation6 + $0xf0] sm:$0xff] }
 0x62b   :  { %3657 = vpow2.f32 %v3048_v54 }
 0x62c   :  { %3659 = vpow2.f32 %v3049_v60 }
 0x62d   :  { %3661 = vtanh.f32 %v2608_v61 }
 0x634   :  { %v3656_v4 = vpop.eup %3655 }
 0x635   :  { %v3658_v63 = vpop.eup %3657  ;;  %v2613_v22 = vadd.f32 1.0, %v3656_v4 }
 0x636   :  { %v2619_v2 = vadd.f32 1.0, %v3658_v63  ;;  %v3660_v3 = vpop.eup %3659 }
 0x637   :  { %3663 = vrcp.f32 %v2613_v22  ;;  %v3662_v5 = vpop.eup %3661  ;;  %v2626_v13 = vadd.f32 1.0, %v3660_v3 }
 0x638   :  { %3665 = vrcp.f32 %v2619_v2 }
 0x639   :  { %3667 = vrcp.f32 %v2626_v13 }
 0x641   :  { %v3664_v6 = vpop.eup %3663 }
 0x642   :  { %v3666_v11 = vpop.eup %3665  ;;  %v2630_v12 = vmul.f32 %v3664_v6, %v3662_v5 }
 0x643   :  { %v2629_v16 = vmul.f32 %v3666_v11, %v4108_v23  ;;  %v3668_v20 = vpop.eup %3667  ;;  %v2811_v23 = vld [vmem:[#allocation6 + $0xe8] sm:$0xff] }
 0x645   :  { %v4146_v19 = vadd.f32 %v2630_v12, %v2629_v16 }
 0x647   :  { %3669 = vtanh.f32 %v4146_v19 }
 0x651   :  { %v3670_v21 = vpop.eup %3669 }
 0x652   :  { %v2633_v36 = vmul.f32 %v3670_v21, %v3668_v20 }
 0x654   :  { %2704 = vmatmul.mubr.f32.vlgmr.msra.gmra.mrb[12].mxu0 %v2633_v36  ;;  %2775 = vmatmul.mubr.f32.vlgmr.msra.gmra.mrb[12].mxu1 %v2633_v36 }
 0x655   :  { %3508 = vmatpush1.bf16.msra.mxu0 %v3824_v8  ;;  %3540 = vmatpush1.bf16.msra.mxu1 %v3837_v25  ;;  %v2636_v8 = vld [vmem:[#allocation6 + $0xc8] sm:$0xff] }
 0x656   :  { %3510 = vmatprep.subr.bf16.mxu0 %v3826_v9  ;;  %3542 = vmatprep.subr.bf16.mxu1 %v3847_v33 }
 0x657   :  { %2878 = vmatprep.mubr.f32.mxu0 %v3779_v0  ;;  %2949 = vmatprep.mubr.f32.mxu1 %v3779_v0  ;;  %v2635_v0 = vld [vmem:[#allocation6 + $0xc0] sm:$0xff] }
 0x659   :  { %3512 = vmatpush1.bf16.msra.mxu0 %v3830_v14  ;;  %3544 = vmatpush1.bf16.msra.mxu1 %v3849_v37 }
 0x65a   :  { %3514 = vmatprep.subr.bf16.mxu0 %v3833_v17  ;;  %3546 = vmatprep.subr.bf16.mxu1 %v3855_v45 }
 0x65d   :  { %3516 = vmatpush1.bf16.msra.mxu0 %v3840_v26  ;;  %3548 = vmatpush1.bf16.msra.mxu1 %v3861_v48 }
 0x65e   :  { %3518 = vmatprep.subr.bf16.mxu0 %v3844_v30  ;;  %3550 = vmatprep.subr.bf16.mxu1 %v3864_v52 }
 0x661   :  { %3520 = vmatpush1.bf16.msra.mxu0 %v3853_v42  ;;  %3552 = vmatpush1.bf16.msra.mxu1 %v3873_v62  ;;  %v2638_v42 = vld [vmem:[#allocation6 + $0xd8] sm:$0xff] }
 0x662   :  { %3522 = vmatprep.subr.bf16.mxu0 %v3858_v46  ;;  %3554 = vmatprep.subr.bf16.mxu1 %v3876_v1  ;;  %v2637_v46 = vld [vmem:[#allocation6 + $0xd0] sm:$0xff] }
 0x665   :  { %3524 = vmatpush1.bf16.msra.mxu0 %v3867_v55  ;;  %3556 = vmatpush1.bf16.msra.mxu1 %v3885_v15 }
 0x666   :  { %3526 = vmatprep.subr.bf16.mxu0 %v3870_v58  ;;  %3558 = vmatprep.subr.bf16.mxu1 %v3888_v18 }
 0x669   :  { %3528 = vmatpush1.bf16.msra.mxu0 %v3879_v7  ;;  %3560 = vmatpush1.bf16.msra.mxu1 %v3897_v31 }
 0x66a   :  { %3530 = vmatprep.subr.bf16.mxu0 %v3882_v10  ;;  %3562 = vmatprep.subr.bf16.mxu1 %v3900_v32 }
 0x66d   :  { %3532 = vmatpush1.bf16.msra.mxu0 %v3891_v24  ;;  %3564 = vmatpush1.bf16.msra.mxu1 %v3907_v40 }
 0x66e   :  { %3534 = vmatprep.subr.bf16.mxu0 %v3894_v27  ;;  %3566 = vmatprep.subr.bf16.mxu1 %v3910_v41 }
 0x671   :  { %3536 = vmatpush1.bf16.msra.mxu0 %v3903_v39  ;;  %3568 = vmatpush1.bf16.msra.mxu1 %v3914_v47  ;;  %v2810_v47 = vld [vmem:[#allocation6 + $0xe0] sm:$0xff] }
 0x727   :  { %v2705_v9 = vpop.f32.mrb[12].mxu0  ;;  %v2776_v14 = vpop.f32.mrb[12].mxu1 }
 0x728   :  { %v2781_v17 = vadd.f32 %v2705_v9, %v2635_v0  ;;  %v2707_v25 = vpop.f32.mrb[13].mxu0  ;;  %v2778_v26 = vpop.f32.mrb[13].mxu1  ;;  %v2783_v52 = vadd.f32 %v2776_v14, %v2637_v46 }
 0x729   :  { %v2782_v30 = vadd.f32 %v2707_v25, %v2636_v8  ;;  %v2784_v45 = vadd.f32 %v2778_v26, %v2638_v42 }
 0x72a   :  { %v3050_v33 = vmul.f32 -1.442695, %v2781_v17 }
 0x72b   :  { %v3051_v37 = vmul.f32 -1.442695, %v2782_v30  ;;  %v3052_v48 = vmul.f32 -1.442695, %v2784_v45 }
 0x72c   :  { %3671 = vpow2.f32 %v3050_v33 }
 0x72d   :  { %3673 = vpow2.f32 %v3051_v37 }
 0x72e   :  { %3675 = vpow2.f32 %v3052_v48 }
 0x72f   :  { %3677 = vtanh.f32 %v2783_v52 }
 0x736   :  { %v3672_v55 = vpop.eup %3671 }
 0x737   :  { %v3674_v58 = vpop.eup %3673  ;;  %v2788_v62 = vadd.f32 1.0, %v3672_v55 }
 0x738   :  { %v2794_v1 = vadd.f32 1.0, %v3674_v58  ;;  %v3676_v7 = vpop.eup %3675 }
 0x739   :  { %3679 = vrcp.f32 %v2788_v62  ;;  %v3678_v10 = vpop.eup %3677  ;;  %v2801_v27 = vadd.f32 1.0, %v3676_v7 }
 0x73a   :  { %3681 = vrcp.f32 %v2794_v1 }
 0x73b   :  { %3683 = vrcp.f32 %v2801_v27 }
 0x743   :  { %v3680_v15 = vpop.eup %3679 }
 0x744   :  { %v3682_v18 = vpop.eup %3681  ;;  %v2805_v24 = vmul.f32 %v3680_v15, %v3678_v10 }
 0x745   :  { %v2804_v31 = vmul.f32 %v3682_v18, %v4146_v19  ;;  %v3684_v39 = vpop.eup %3683 }
 0x747   :  { %v2806_v32 = vadd.f32 %v2805_v24, %v2804_v31 }
 0x749   :  { %3685 = vtanh.f32 %v2806_v32 }
 0x753   :  { %v3686_v40 = vpop.eup %3685 }
 0x754   :  { %v2808_v41 = vmul.f32 %v3686_v40, %v3684_v39 }
 0x756   :  { %2879 = vmatmul.mubr.f32.vlgmr.msra.gmra.mrb[14].mxu0 %v2808_v41  ;;  %2950 = vmatmul.mubr.f32.vlgmr.msra.gmra.mrb[14].mxu1 %v2808_v41 }
 0x829   :  { %v2880_v38 = vpop.f32.mrb[14].mxu0  ;;  %v2951_v43 = vpop.f32.mrb[14].mxu1 }
 0x82a   :  { %v2956_v28 = vadd.f32 %v2880_v38, %v2810_v47  ;;  %v2882_v29 = vpop.f32.mrb[15].mxu0  ;;  %v2953_v34 = vpop.f32.mrb[15].mxu1  ;;  %v2958_v56 = vadd.f32 %v2951_v43, %v2812_v53 }
 0x82b   :  { %v2957_v35 = vadd.f32 %v2882_v29, %v2811_v23  ;;  %v2959_v51 = vadd.f32 %v2953_v34, %v2813_v50 }
 0x82c   :  { %v3053_v44 = vmul.f32 -1.442695, %v2956_v28 }
 0x82d   :  { %v3054_v49 = vmul.f32 -1.442695, %v2957_v35  ;;  %v3055_v54 = vmul.f32 -1.442695, %v2959_v51 }
 0x82e   :  { %3687 = vpow2.f32 %v3053_v44 }
 0x82f   :  { %3689 = vpow2.f32 %v3054_v49 }
 0x830   :  { %3691 = vpow2.f32 %v3055_v54 }
 0x831   :  { %3693 = vtanh.f32 %v2958_v56 }
 0x838   :  { %v3688_v57 = vpop.eup %3687 }
 0x839   :  { %v3690_v59 = vpop.eup %3689  ;;  %v2963_v60 = vadd.f32 1.0, %v3688_v57 }
 0x83a   :  { %v2969_v61 = vadd.f32 1.0, %v3690_v59  ;;  %v3692_v4 = vpop.eup %3691 }
 0x83b   :  { %3695 = vrcp.f32 %v2963_v60  ;;  %v3694_v63 = vpop.eup %3693  ;;  %v2976_v5 = vadd.f32 1.0, %v3692_v4 }
 0x83c   :  { %3697 = vrcp.f32 %v2969_v61 }
 0x83d   :  { %3699 = vrcp.f32 %v2976_v5 }
 0x845   :  { %v3696_v22 = vpop.eup %3695 }
 0x846   :  { %v3698_v2 = vpop.eup %3697  ;;  %v2980_v3 = vmul.f32 %v3696_v22, %v3694_v63 }
 0x847   :  { %v2979_v6 = vmul.f32 %v3698_v2, %v2806_v32  ;;  %v3700_v12 = vpop.eup %3699 }
 0x849   :  { %v2981_v11 = vadd.f32 %v2980_v3, %v2979_v6 }
 0x84b   :  { %3701 = vtanh.f32 %v2981_v11 }
 0x855   :  { %v3702_v13 = vpop.eup %3701 }
 0x856   :  { %v2983_v16 = vmul.f32 %v3702_v13, %v3700_v12 }
 0x858   :  { %2986 = vst [vmem:[#allocation9] sm:$0xff] %v2983_v16 }
 0x859   :  { %3758 = shalt.err (!%p3755_p6)
}
 0x85a   :  { %s3759_s10 = scalar_lea.hbm %s4196_s2, 128 }
 0x85b   :  { %p3760_p7 = scmp.ne.s32.totalorder %s4196_s2, %s3759_s10  ;;  %p3763_p8 = scmp.lt.u32.totalorder %s3759_s10, %s4196_s2 }
 0x85d   :  { %p3765_p9 = pnand %p3763_p8, %p3760_p7 }
 0x85f   :  { %3768 = shalt.err (!%p3765_p9)
}
 0x860   :  { %2996 = dma.vmem_to_hbm [thread:$0]  %s2994_s6, 128, %s4196_s2, [#allocation8]  }
 0x861   :  { %3773 = dma.done.wait [#allocation8], 128  }
 0x862   :  { %3774 = vsyncadd [#allocation8], 4294967168 }
 0x863   :  { %3000 = vsyncpa [#allocation7], 1 }
 0x864   :  { %3001 = vsyncpa [#allocation8], 1 }
 0x865   :  { %3002 = vsyncmov [#allocation5] }
 0x868   :  { %s3003_s17 = vpop.sfrf %3002 }
 0x869   :  { %p3056_p10 = scmp.ne.s32.totalorder %s3003_s17, 0 }
 0x86b   :  { %3007 = shalt.err (%p3056_p10)  }

</bundles_post_ra>
